<compile_context>
chip_gen: v7x
topology: tpu7x:2x2x1
jax: 0.10.0
libtpu: 0.0.40
codegen_flags: <defaults>
</compile_context>

<pallas_src>
import jax
import jax.numpy as jnp
from jax.experimental import pallas as pl
from jax.experimental.pallas import tpu as pltpu


_NEG_BIG = -1e30  # finite "minus infinity" for padded output columns (avoids NaN/inf)


def _logreg_kernel(x_ref, wt_ref, b_ref, o_ref):
    """Fused linear + softmax for one batch tile.

    x_ref : (TB, D)      VMEM
    wt_ref: (D, O_pad)   VMEM   (pre-transposed once in the wrapper)
    b_ref : (1, O_pad)   VMEM   (padded entries hold a large negative constant)
    o_ref : (TB, O_pad)  VMEM
    """
    x = x_ref[...]
    wt = wt_ref[...]

    # MXU matmul, f32 accumulate; plain NN contraction -> no weight transpose in-kernel.
    logits = jnp.dot(x, wt, preferred_element_type=jnp.float32) + b_ref[...]

    # Numerically-stable softmax along the output-feature axis (f32 throughout).
    m = jnp.max(logits, axis=-1, keepdims=True)
    e = jnp.exp(logits - m)            # padded columns: exp(-1e30 - m) == 0
    denom = jnp.sum(e, axis=-1, keepdims=True)
    o_ref[...] = (e / denom).astype(o_ref.dtype)


def _round_up(n, m):
    return ((n + m - 1) // m) * m


def _vmem_budget_bytes():
    """Per-generation VMEM capacity minus headroom (v5e/v6e: 128 MiB, v7x: 64 MiB)."""
    cap = 64 << 20  # conservative fallback
    try:
        info = pltpu.get_tpu_info()
        cap = int(getattr(info, "vmem_capacity_bytes", cap))
    except Exception:
        pass
    headroom = 12 << 20  # compiler internal scratch + pipeline slack
    return max(cap - headroom, 16 << 20)


def logistic_regression_forward(x, weight, bias, *, tb_max=1024, out_dtype=jnp.float32):
    """x: [B, D] f32, weight: [O, D] f32 (PyTorch nn.Linear layout), bias: [O] f32."""
    B, D = x.shape
    O = weight.shape[0]
    assert weight.shape == (O, D) and bias.shape == (O,)
    itemsize = 4  # f32

    # ---- output-feature padding to a lane multiple (lane-dense stores, full MXU N) ----
    O_pad = max(128, _round_up(O, 128))
    # One-time wrapper-side transpose + zero-pad -> (D, O_pad).
    wt = jnp.zeros((D, O_pad), jnp.float32).at[:, :O].set(weight.astype(jnp.float32).T)
    b2d = jnp.full((1, O_pad), _NEG_BIG, dtype=jnp.float32).at[0, :O].set(
        bias.astype(jnp.float32))

    # ---- budget-driven batch tile ----
    budget = _vmem_budget_bytes()
    tb_gran = 256                      # MXU M granularity (also a multiple of 128 for v5e)
    slack = 4 << 20
    w_resident = D * O_pad * itemsize  # weight resident across the whole grid
    per_row = 2 * itemsize * (D + O_pad)   # double-buffered x tile + out tile, per row

    avail = budget - w_resident - slack
    tb_budget = (avail // per_row) if avail > 0 else 0
    tb_budget = (tb_budget // tb_gran) * tb_gran

    tb_from_batch = _round_up(max(B, 1), tb_gran)
    if tb_from_batch > tb_gran:
        # Aim for >= 2 grid steps so both TCs (v7x) / megacore halves get work.
        tb_from_batch = _round_up(-(-B // 2), tb_gran)

    if tb_budget >= tb_gran:
        TB = max(tb_gran, min(tb_max, tb_from_batch, tb_budget))
    else:
        # Resident weight leaves no room for an MXU-granular batch tile in VMEM.
        # TODO(synk): add an O-tile grid axis with an online-softmax accumulator
        # for very large classification heads instead of shrinking the batch tile.
        TB = max(8, min(tb_max, _round_up(max(B, 1), 8)))

    B_pad = _round_up(B, TB)
    if B_pad != B:
        # Zero-padded rows -> logits == bias -> finite softmax; sliced off below.
        x = jnp.pad(x, ((0, B_pad - B), (0, 0)))

    grid = (B_pad // TB,)

    # VMEM request: resident weight (single-buffered) + bias + double-buffered tiles + slack.
    est = (w_resident + 2 * O_pad * itemsize
           + 2 * TB * D * itemsize + 2 * TB * O_pad * itemsize + slack)
    vmem_limit = int(min(max(est, 32 << 20), budget))

    def build(single_buffer_invariants):
        inv_kwargs = (dict(pipeline_mode=pl.Buffered(1))
                      if single_buffer_invariants else {})
        return pl.pallas_call(
            _logreg_kernel,
            out_shape=jax.ShapeDtypeStruct((B_pad, O_pad), out_dtype),
            grid_spec=pl.GridSpec(
                grid=grid,
                in_specs=[
                    pl.BlockSpec((TB, D), lambda i: (i, 0)),                 # batch-tiled x
                    pl.BlockSpec((D, O_pad), lambda i: (0, 0), **inv_kwargs),  # resident W^T
                    pl.BlockSpec((1, O_pad), lambda i: (0, 0), **inv_kwargs),  # resident bias
                ],
                out_specs=pl.BlockSpec((TB, O_pad), lambda i: (i, 0)),
            ),
            compiler_params=pltpu.CompilerParams(
                dimension_semantics=("parallel",),
                vmem_limit_bytes=vmem_limit,
            ),
        )

    try:
        out = build(True)(x, wt, b2d)
    except Exception:
        # Fallback for JAX versions that reject single-buffered pipeline_mode.
        out = build(False)(x, wt, b2d)

    return out[:B, :O]


if __name__ == "__main__":
    # Small shapes consistent with the module: batch=8, input_size=32, output_size=16.
    batch, input_size, output_size = 8, 32, 16

    key = jax.random.PRNGKey(0)
    kx, kw, kb = jax.random.split(key, 3)

    # Deterministic parameter init (PyTorch nn.Linear-style uniform bound).
    bound = 1.0 / (input_size ** 0.5)
    weight = jax.random.uniform(kw, (output_size, input_size),
                                minval=-bound, maxval=bound, dtype=jnp.float32)
    bias = jax.random.uniform(kb, (output_size,),
                              minval=-bound, maxval=bound, dtype=jnp.float32)
    x = jax.random.normal(kx, (batch, input_size), dtype=jnp.float32)

    out = logistic_regression_forward(x, weight, bias)
    out = jax.block_until_ready(out)

    # Sanity check against pure-JAX reference.
    ref = jax.nn.softmax(x @ weight.T + bias, axis=-1)
    assert out.shape == (batch, output_size)
    assert jnp.allclose(out, ref, atol=2e-3, rtol=2e-3), "mismatch vs reference"
    assert jnp.allclose(jnp.sum(out, axis=-1), 1.0, atol=1e-4), "rows must sum to 1"

    print("KERNEL_OK")
</pallas_src>

<mosaic_0001>
module attributes {stable_mosaic.version = 11 : i64} {
  func.func @_logreg_kernel(%arg0: i32, %arg1: memref<256x32xf32, #tpu.memory_space<vmem>>, %arg2: memref<32x128xf32, #tpu.memory_space<vmem>>, %arg3: memref<1x128xf32, #tpu.memory_space<vmem>>, %arg4: memref<256x128xf32, #tpu.memory_space<vmem>>) attributes {dimension_semantics = [#tpu.dimension_semantics<parallel>], iteration_bounds = array<i64: 1>, scalar_prefetch = 0 : i64, scratch_operands = 0 : i64, tpu.core_type = #tpu.core_type<tc>, window_params = [{transform_indices = @transform_0, window_bounds = array<i64: 256, 32>}, {pipeline_mode = #tpu.pipeline_mode<synchronous>, transform_indices = @transform_1, window_bounds = array<i64: 32, 128>}, {pipeline_mode = #tpu.pipeline_mode<synchronous>, transform_indices = @transform_2, window_bounds = array<i64: 1, 128>}, {transform_indices = @transform_3, window_bounds = array<i64: 256, 128>}]} {
    %c0 = arith.constant 0 : index
    %c0_0 = arith.constant 0 : index
    %0 = vector.load %arg1[%c0, %c0_0] : memref<256x32xf32, #tpu.memory_space<vmem>>, vector<256x32xf32>
    %c0_1 = arith.constant 0 : index
    %c0_2 = arith.constant 0 : index
    %1 = vector.load %arg2[%c0_1, %c0_2] : memref<32x128xf32, #tpu.memory_space<vmem>>, vector<32x128xf32>
    %cst = arith.constant dense<0.000000e+00> : vector<256x128xf32>
    %2 = tpu.matmul %0, %1, %cst {dimension_numbers = #tpu.dot_dimension_numbers<[1], [0], [0], [1], [0, 0, 1, 1], [], []>} : vector<256x32xf32>, vector<32x128xf32>, vector<256x128xf32> -> vector<256x128xf32>
    %c0_3 = arith.constant 0 : index
    %c0_4 = arith.constant 0 : index
    %3 = vector.load %arg3[%c0_3, %c0_4] : memref<1x128xf32, #tpu.memory_space<vmem>>, vector<1x128xf32>
    %4 = vector.broadcast %3 : vector<1x128xf32> to vector<256x128xf32>
    %5 = arith.addf %2, %4 : vector<256x128xf32>
    %cst_5 = arith.constant dense<0xFF800000> : vector<256xf32>
    %6 = vector.multi_reduction <maximumf>, %5, %cst_5 [1] : vector<256x128xf32> to vector<256xf32>
    %7 = vector.shape_cast %6 : vector<256xf32> to vector<256x1xf32>
    %8 = vector.broadcast %7 : vector<256x1xf32> to vector<256x128xf32>
    %9 = arith.subf %5, %8 : vector<256x128xf32>
    %10 = math.exp %9 : vector<256x128xf32>
    %cst_6 = arith.constant dense<0.000000e+00> : vector<256xf32>
    %11 = vector.multi_reduction <add>, %10, %cst_6 [1] : vector<256x128xf32> to vector<256xf32>
    %12 = vector.shape_cast %11 : vector<256xf32> to vector<256x1xf32>
    %13 = vector.broadcast %12 : vector<256x1xf32> to vector<256x128xf32>
    %14 = arith.divf %10, %13 : vector<256x128xf32>
    %c0_7 = arith.constant 0 : index
    %c0_8 = arith.constant 0 : index
    %15 = vector.load %arg4[%c0_7, %c0_8] : memref<256x128xf32, #tpu.memory_space<vmem>>, vector<256x128xf32>
    tpu.vector_store %arg4[%c0_7, %c0_8], %14 {strides = array<i32>} : memref<256x128xf32, #tpu.memory_space<vmem>>, vector<256x128xf32>,
    return
  }
  func.func @transform_0(%arg0: i32) -> (i32, i32) {
    %c0_i32 = arith.constant 0 : i32
    %c0_i32_0 = arith.constant 0 : i32
    return %arg0, %c0_i32 : i32, i32
  }
  func.func @transform_1(%arg0: i32) -> (i32, i32) {
    %c0_i32 = arith.constant 0 : i32
    %c0_i32_0 = arith.constant 0 : i32
    %c0_i32_1 = arith.constant 0 : i32
    return %c0_i32, %c0_i32_0 : i32, i32
  }
  func.func @transform_2(%arg0: i32) -> (i32, i32) {
    %c0_i32 = arith.constant 0 : i32
    %c0_i32_0 = arith.constant 0 : i32
    %c0_i32_1 = arith.constant 0 : i32
    return %c0_i32, %c0_i32_0 : i32, i32
  }
  func.func @transform_3(%arg0: i32) -> (i32, i32) {
    %c0_i32 = arith.constant 0 : i32
    %c0_i32_0 = arith.constant 0 : i32
    return %arg0, %c0_i32 : i32, i32
  }
}

module attributes {stable_mosaic.version = 11 : i64} {
  func.func @_logreg_kernel(%arg0: i32, %arg1: memref<256x32xf32, #tpu.memory_space<vmem>>, %arg2: memref<32x128xf32, #tpu.memory_space<vmem>>, %arg3: memref<1x128xf32, #tpu.memory_space<vmem>>, %arg4: memref<256x128xf32, #tpu.memory_space<vmem>>) attributes {dimension_semantics = [#tpu.dimension_semantics<parallel>], iteration_bounds = array<i64: 1>, scalar_prefetch = 0 : i64, scratch_operands = 0 : i64, tpu.core_type = #tpu.core_type<tc>, window_params = [{transform_indices = @transform_0, window_bounds = array<i64: 256, 32>}, {pipeline_mode = #tpu.pipeline_mode<synchronous>, transform_indices = @transform_1, window_bounds = array<i64: 32, 128>}, {pipeline_mode = #tpu.pipeline_mode<synchronous>, transform_indices = @transform_2, window_bounds = array<i64: 1, 128>}, {transform_indices = @transform_3, window_bounds = array<i64: 256, 128>}]} {
    %c0 = arith.constant 0 : index
    %c0_0 = arith.constant 0 : index
    %0 = vector.load %arg1[%c0, %c0_0] : memref<256x32xf32, #tpu.memory_space<vmem>>, vector<256x32xf32>
    %c0_1 = arith.constant 0 : index
    %c0_2 = arith.constant 0 : index
    %1 = vector.load %arg2[%c0_1, %c0_2] : memref<32x128xf32, #tpu.memory_space<vmem>>, vector<32x128xf32>
    %cst = arith.constant dense<0.000000e+00> : vector<256x128xf32>
    %2 = tpu.matmul %0, %1, %cst {dimension_numbers = #tpu.dot_dimension_numbers<[1], [0], [0], [1], [0, 0, 1, 1], [], []>} : vector<256x32xf32>, vector<32x128xf32>, vector<256x128xf32> -> vector<256x128xf32>
    %c0_3 = arith.constant 0 : index
    %c0_4 = arith.constant 0 : index
    %3 = vector.load %arg3[%c0_3, %c0_4] : memref<1x128xf32, #tpu.memory_space<vmem>>, vector<1x128xf32>
    %4 = vector.broadcast %3 : vector<1x128xf32> to vector<256x128xf32>
    %5 = arith.addf %2, %4 : vector<256x128xf32>
    %cst_5 = arith.constant dense<0xFF800000> : vector<256xf32>
    %6 = vector.multi_reduction <maximumf>, %5, %cst_5 [1] : vector<256x128xf32> to vector<256xf32>
    %7 = vector.shape_cast %6 : vector<256xf32> to vector<256x1xf32>
    %8 = vector.broadcast %7 : vector<256x1xf32> to vector<256x128xf32>
    %9 = arith.subf %5, %8 : vector<256x128xf32>
    %10 = math.exp %9 : vector<256x128xf32>
    %cst_6 = arith.constant dense<0.000000e+00> : vector<256xf32>
    %11 = vector.multi_reduction <add>, %10, %cst_6 [1] : vector<256x128xf32> to vector<256xf32>
    %12 = vector.shape_cast %11 : vector<256xf32> to vector<256x1xf32>
    %13 = vector.broadcast %12 : vector<256x1xf32> to vector<256x128xf32>
    %14 = arith.divf %10, %13 : vector<256x128xf32>
    %c0_7 = arith.constant 0 : index
    %c0_8 = arith.constant 0 : index
    %15 = vector.load %arg4[%c0_7, %c0_8] : memref<256x128xf32, #tpu.memory_space<vmem>>, vector<256x128xf32>
    tpu.vector_store %arg4[%c0_7, %c0_8], %14 {strides = array<i32>} : memref<256x128xf32, #tpu.memory_space<vmem>>, vector<256x128xf32>,
    return
  }
  func.func @transform_0(%arg0: i32) -> (i32, i32) {
    %c0_i32 = arith.constant 0 : i32
    %c0_i32_0 = arith.constant 0 : i32
    return %arg0, %c0_i32 : i32, i32
  }
  func.func @transform_1(%arg0: i32) -> (i32, i32) {
    %c0_i32 = arith.constant 0 : i32
    %c0_i32_0 = arith.constant 0 : i32
    %c0_i32_1 = arith.constant 0 : i32
    return %c0_i32, %c0_i32_0 : i32, i32
  }
  func.func @transform_2(%arg0: i32) -> (i32, i32) {
    %c0_i32 = arith.constant 0 : i32
    %c0_i32_0 = arith.constant 0 : i32
    %c0_i32_1 = arith.constant 0 : i32
    return %c0_i32, %c0_i32_0 : i32, i32
  }
  func.func @transform_3(%arg0: i32) -> (i32, i32) {
    %c0_i32 = arith.constant 0 : i32
    %c0_i32_0 = arith.constant 0 : i32
    return %arg0, %c0_i32 : i32, i32
  }
}

</mosaic_0001>

<bundles_post_ra>
// kernel: tpu_custom_call.1
= control target key start
LH: loop header
LB: loop body
LE: loop exit
PB: predicated region body
PF: predicated region fallthrough
CT: control target
= control target key end

     0   :  { %vm58_vm0 = vcmask 261120   ;;  %s1476_s0 = inlined_call_operand.vmem [shape: f32[256,32], index: 0, kind: input, shape index: {}]   ;;  %s1477_s1 = inlined_call_operand.vmem [shape: f32[32,128], index: 1, kind: input, shape index: {}]   ;;  %s1478_s2 = inlined_call_operand.vmem [shape: f32[1,128], index: 2, kind: input, shape index: {}]   ;;  %s1479_s3 = inlined_call_operand.hbm [shape: f32[256,128], index: 3, kind: output, shape index: {}]  }
   0x1   :  { %v47_v0 = vld [vmem:[%s1477_s1] sm:$0xff]  ;;  %v48_v1 = vld [vmem:[%s1477_s1 + $0x8] sm:$0xff]  ;;  %v49_v2 = vld [vmem:[%s1477_s1 + $0x10] sm:$0xff] }
   0x2   :  { %v841_v3 = vpack.c.bf16 %v48_v1, %v47_v0  ;;  %v50_v4 = vld [vmem:[%s1477_s1 + $0x18] sm:$0xff]  ;;  %v15_v5 = vld [vmem:[%s1476_s0] sm:$0xff]  ;;  %v16_v8 = vld [vmem:[%s1476_s0 + $0x8] sm:$0xff] }
   0x3   :  { %v31_v6 = vld [vmem:[%s1476_s0 + $0x80] sm:$0xff]  ;;  %v845_v7 = vpack.c.bf16 %v50_v4, %v49_v2  ;;  %793 = vmatprep.mubr.msk.f32.mxu0 %vm58_vm0, %v15_v5  ;;  %v32_v9 = vld [vmem:[%s1476_s0 + $0x88] sm:$0xff]  ;;  %v17_v10 = vld [vmem:[%s1476_s0 + $0x10] sm:$0xff] }
   0x4   :  { %817 = vmatprep.mubr.msk.f32.mxu1 %vm58_vm0, %v31_v6  ;;  %842 = vmatprep.subr.bf16.mxu0 %v841_v3  ;;  %v33_v11 = vld [vmem:[%s1476_s0 + $0x90] sm:$0xff]  ;;  %v18_v12 = vld [vmem:[%s1476_s0 + $0x18] sm:$0xff] }
   0x5   :  { %849 = vmatprep.subr.bf16.mxu1 %v841_v3  ;;  %844 = vmatpush3.bf16.msra.mxu0 %v841_v3  ;;  %v34_v13 = vld [vmem:[%s1476_s0 + $0x98] sm:$0xff] }
   0x6   :  { %851 = vmatpush3.bf16.msra.mxu1 %v841_v3  ;;  %846 = vmatprep.subr.bf16.mxu0 %v845_v7 }
   0x7   :  { %850 = vmatprep.subr.bf16.mxu1 %v845_v7 }
   0x9   :  { %848 = vmatpush3.bf16.msra.mxu0 %v845_v7 }
   0xa   :  { %852 = vmatpush3.bf16.msra.mxu1 %v845_v7 }
   0xc   :  { %794 = vmatmul.mubr.msk.f32.vlgmr.msra.gmra.mrb[0].mxu0 %vm58_vm0, %v16_v8 }
   0xd   :  { %818 = vmatmul.mubr.msk.f32.vlgmr.msra.gmra.mrb[0].mxu1 %vm58_vm0, %v32_v9  ;;  %796 = vmatprep.mubr.msk.f32.mxu0 %vm58_vm0, %v17_v10 }
   0xe   :  { %820 = vmatprep.mubr.msk.f32.mxu1 %vm58_vm0, %v33_v11 }
   0xf   :  { %8 = vsyncpa [#allocation3], 0  ;;  %v19_v14 = vld [vmem:[%s1476_s0 + $0x20] sm:$0xff]  ;;  %v20_v16 = vld [vmem:[%s1476_s0 + $0x28] sm:$0xff] }
  0x10   :  { %v35_v15 = vld [vmem:[%s1476_s0 + $0xa0] sm:$0xff]  ;;  %797 = vmatmul.mubr.msk.f32.gmra.mrb[2].mxu0 %vm58_vm0, %v18_v12  ;;  %v36_v17 = vld [vmem:[%s1476_s0 + $0xa8] sm:$0xff]  ;;  %v21_v18 = vld [vmem:[%s1476_s0 + $0x30] sm:$0xff] }
  0x11   :  { %821 = vmatmul.mubr.msk.f32.gmra.mrb[2].mxu1 %vm58_vm0, %v34_v13  ;;  %799 = vmatprep.mubr.msk.f32.mxu0 %vm58_vm0, %v19_v14  ;;  %v37_v19 = vld [vmem:[%s1476_s0 + $0xb0] sm:$0xff]  ;;  %v22_v20 = vld [vmem:[%s1476_s0 + $0x38] sm:$0xff]  ;;  %v23_v22 = vld [vmem:[%s1476_s0 + $0x40] sm:$0xff] }
  0x12   :  { %823 = vmatprep.mubr.msk.f32.mxu1 %vm58_vm0, %v35_v15  ;;  %v38_v21 = vld [vmem:[%s1476_s0 + $0xb8] sm:$0xff]  ;;  %v39_v23 = vld [vmem:[%s1476_s0 + $0xc0] sm:$0xff]  ;;  %v24_v24 = vld [vmem:[%s1476_s0 + $0x48] sm:$0xff] }
  0x13   :  { %v40_v25 = vld [vmem:[%s1476_s0 + $0xc8] sm:$0xff]  ;;  %v25_v26 = vld [vmem:[%s1476_s0 + $0x50] sm:$0xff]  ;;  %v26_v28 = vld [vmem:[%s1476_s0 + $0x58] sm:$0xff] }
  0x14   :  { %800 = vmatmul.mubr.msk.f32.gmra.mrb[4].mxu0 %vm58_vm0, %v20_v16  ;;  %v41_v27 = vld [vmem:[%s1476_s0 + $0xd0] sm:$0xff]  ;;  %v42_v29 = vld [vmem:[%s1476_s0 + $0xd8] sm:$0xff]  ;;  %v27_v30 = vld [vmem:[%s1476_s0 + $0x60] sm:$0xff] }
  0x15   :  { %824 = vmatmul.mubr.msk.f32.gmra.mrb[4].mxu1 %vm58_vm0, %v36_v17  ;;  %802 = vmatprep.mubr.msk.f32.mxu0 %vm58_vm0, %v21_v18  ;;  %v43_v31 = vld [vmem:[%s1476_s0 + $0xe0] sm:$0xff]  ;;  %v28_v32 = vld [vmem:[%s1476_s0 + $0x68] sm:$0xff]  ;;  %v29_v34 = vld [vmem:[%s1476_s0 + $0x70] sm:$0xff] }
  0x16   :  { %826 = vmatprep.mubr.msk.f32.mxu1 %vm58_vm0, %v37_v19  ;;  %v44_v33 = vld [vmem:[%s1476_s0 + $0xe8] sm:$0xff]  ;;  %v45_v35 = vld [vmem:[%s1476_s0 + $0xf0] sm:$0xff]  ;;  %v30_v36 = vld [vmem:[%s1476_s0 + $0x78] sm:$0xff] }
  0x17   :  { %v46_v37 = vld [vmem:[%s1476_s0 + $0xf8] sm:$0xff]  ;;  %v1174_v38 = vld [vmem:[%s1478_s2] ss:$0 sm:$0xff]  ;;  %s1008_s0 = smov [#allocation2]  }
  0x18   :  { %803 = vmatmul.mubr.msk.f32.gmra.mrb[6].mxu0 %vm58_vm0, %v22_v20  ;;  %s705_s2 = sshll.u32 %s1008_s0, 4  ;;  %s706_s2 = int_to_ptr.vmem [resolvable:$true] %s705_s2 }
  0x19   :  { %827 = vmatmul.mubr.msk.f32.gmra.mrb[6].mxu1 %vm58_vm0, %v38_v21  ;;  %805 = vmatprep.mubr.msk.f32.mxu0 %vm58_vm0, %v23_v22  ;;  %s984_s29 = scalar_lea.vmem %s706_s2, 4096  ;;  %p989_p1 = scmp.lt.s32.totalorder %s706_s2, %s706_s2 }
  0x1a   :  { %829 = vmatprep.mubr.msk.f32.mxu1 %vm58_vm0, %v39_v23  ;;  %p985_p0 = scmp.ne.s32.totalorder %s706_s2, %s984_s29  ;;  %p990_p2 = scmp.lt.s32.totalorder %s984_s29, %s984_s29 }
  0x1c   :  { %806 = vmatmul.mubr.msk.f32.gmra.mrb[8].mxu0 %vm58_vm0, %v24_v24  ;;  %p991_p3 = por %p990_p2, %p989_p1 }
  0x1d   :  { %830 = vmatmul.mubr.msk.f32.gmra.mrb[8].mxu1 %vm58_vm0, %v40_v25  ;;  %808 = vmatprep.mubr.msk.f32.mxu0 %vm58_vm0, %v25_v26 }
  0x1e   :  { %832 = vmatprep.mubr.msk.f32.mxu1 %vm58_vm0, %v41_v27  ;;  %p992_p4 = pnand %p991_p3, %p985_p0 }
  0x20   :  { %809 = vmatmul.mubr.msk.f32.gmra.mrb[10].mxu0 %vm58_vm0, %v26_v28 }
  0x21   :  { %833 = vmatmul.mubr.msk.f32.gmra.mrb[10].mxu1 %vm58_vm0, %v42_v29  ;;  %811 = vmatprep.mubr.msk.f32.mxu0 %vm58_vm0, %v27_v30 }
  0x22   :  { %835 = vmatprep.mubr.msk.f32.mxu1 %vm58_vm0, %v43_v31 }
  0x24   :  { %812 = vmatmul.mubr.msk.f32.gmra.mrb[12].mxu0 %vm58_vm0, %v28_v32 }
  0x25   :  { %836 = vmatmul.mubr.msk.f32.gmra.mrb[12].mxu1 %vm58_vm0, %v44_v33  ;;  %814 = vmatprep.mubr.msk.f32.mxu0 %vm58_vm0, %v29_v34 }
  0x26   :  { %838 = vmatprep.mubr.msk.f32.mxu1 %vm58_vm0, %v45_v35 }
  0x28   :  { %815 = vmatmul.mubr.msk.f32.gmra.mrb[14].mxu0 %vm58_vm0, %v30_v36 }
  0x29   :  { %839 = vmatmul.mubr.msk.f32.gmra.mrb[14].mxu1 %vm58_vm0, %v46_v37 }
  0xdf   :  { %v795_v39 = vpop.f32.mrb[0].mxu0 }
  0xe0   :  { %v819_v40 = vpop.f32.mrb[0].mxu1  ;;  %v1177_v41 = vadd.f32 %v795_v39, %v1174_v38  ;;  %v221_v43 = vpop.f32.mrb[1].mxu0 }
  0xe1   :  { %v1180_v42 = vadd.f32 %v819_v40, %v1174_v38  ;;  %v301_v44 = vpop.f32.mrb[1].mxu1  ;;  %v1185_v47 = vadd.f32 %v1174_v38, %v221_v43 }
  0xe2   :  { %382 = vmax.xlane.f32.xlu0 %v1177_v41  ;;  %v1196_v54 = vadd.f32 %v1174_v38, %v301_v44 }
  0xe3   :  { %414 = vmax.xlane.f32.xlu1 %v1180_v42  ;;  %v798_v45 = vpop.f32.mrb[2].mxu0 }
  0xe4   :  { %v822_v46 = vpop.f32.mrb[2].mxu1  ;;  %v1188_v48 = vadd.f32 %v798_v45, %v1174_v38  ;;  %v231_v49 = vpop.f32.mrb[3].mxu0 }
  0xe5   :  { %v311_v50 = vpop.f32.mrb[3].mxu1  ;;  %v1191_v51 = vadd.f32 %v822_v46, %v1174_v38  ;;  %v1201_v59 = vadd.f32 %v1174_v38, %v231_v49 }
  0xe6   :  { %380 = vmax.xlane.f32.xlu0 %v1185_v47  ;;  %v1204_v60 = vadd.f32 %v1174_v38, %v311_v50 }
  0xe7   :  { %386 = vmax.xlane.f32.xlu1 %v1188_v48  ;;  %v801_v52 = vpop.f32.mrb[4].mxu0 }
  0xe8   :  { %v825_v53 = vpop.f32.mrb[4].mxu1  ;;  %v241_v55 = vpop.f32.mrb[5].mxu0  ;;  %v1207_v63 = vadd.f32 %v801_v52, %v1174_v38 }
  0xe9   :  { %v321_v56 = vpop.f32.mrb[5].mxu1  ;;  %v1212_v0 = vadd.f32 %v1174_v38, %v241_v55  ;;  %v1215_v5 = vadd.f32 %v825_v53, %v1174_v38 }
  0xea   :  { %412 = vmax.xlane.f32.xlu0 %v1196_v54  ;;  %v1220_v6 = vadd.f32 %v1174_v38, %v321_v56 }
  0xeb   :  { %418 = vmax.xlane.f32.xlu1 %v1191_v51  ;;  %v804_v57 = vpop.f32.mrb[6].mxu0 }
  0xec   :  { %v828_v58 = vpop.f32.mrb[6].mxu1  ;;  %v251_v61 = vpop.f32.mrb[7].mxu0  ;;  %v1223_v11 = vadd.f32 %v804_v57, %v1174_v38 }
  0xed   :  { %v331_v62 = vpop.f32.mrb[7].mxu1  ;;  %v1228_v12 = vadd.f32 %v1174_v38, %v251_v61  ;;  %v1231_v17 = vadd.f32 %v828_v58, %v1174_v38 }
  0xee   :  { %416 = vmax.xlane.f32.xlu0 %v1204_v60  ;;  %v1236_v18 = vadd.f32 %v1174_v38, %v331_v62 }
  0xef   :  { %384 = vmax.xlane.f32.xlu1 %v1201_v59  ;;  %v807_v1 = vpop.f32.mrb[8].mxu0 }
  0xf0   :  { %v831_v2 = vpop.f32.mrb[8].mxu1  ;;  %v261_v3 = vpop.f32.mrb[9].mxu0  ;;  %v1239_v23 = vadd.f32 %v807_v1, %v1174_v38 }
  0xf1   :  { %v341_v4 = vpop.f32.mrb[9].mxu1  ;;  %v1244_v24 = vadd.f32 %v1174_v38, %v261_v3  ;;  %v1247_v25 = vadd.f32 %v831_v2, %v1174_v38 }
  0xf2   :  { %388 = vmax.xlane.f32.xlu0 %v1212_v0  ;;  %v1252_v26 = vadd.f32 %v1174_v38, %v341_v4 }
  0xf3   :  { %390 = vmax.xlane.f32.xlu1 %v1207_v63  ;;  %v810_v7 = vpop.f32.mrb[10].mxu0 }
  0xf4   :  { %v834_v8 = vpop.f32.mrb[10].mxu1  ;;  %v271_v9 = vpop.f32.mrb[11].mxu0  ;;  %v1255_v27 = vadd.f32 %v810_v7, %v1174_v38 }
  0xf5   :  { %v351_v10 = vpop.f32.mrb[11].mxu1  ;;  %v1260_v28 = vadd.f32 %v1174_v38, %v271_v9  ;;  %v1263_v29 = vadd.f32 %v834_v8, %v1174_v38 }
  0xf6   :  { %420 = vmax.xlane.f32.xlu0 %v1220_v6  ;;  %v1268_v30 = vadd.f32 %v1174_v38, %v351_v10 }
  0xf7   :  { %422 = vmax.xlane.f32.xlu1 %v1215_v5  ;;  %v813_v13 = vpop.f32.mrb[12].mxu0 }
  0xf8   :  { %v837_v14 = vpop.f32.mrb[12].mxu1  ;;  %v281_v15 = vpop.f32.mrb[13].mxu0  ;;  %v1271_v31 = vadd.f32 %v813_v13, %v1174_v38 }
  0xf9   :  { %v361_v16 = vpop.f32.mrb[13].mxu1  ;;  %v1276_v32 = vadd.f32 %v1174_v38, %v281_v15  ;;  %v1279_v33 = vadd.f32 %v837_v14, %v1174_v38 }
  0xfa   :  { %392 = vmax.xlane.f32.xlu0 %v1228_v12  ;;  %v1284_v34 = vadd.f32 %v1174_v38, %v361_v16 }
  0xfb   :  { %394 = vmax.xlane.f32.xlu1 %v1223_v11  ;;  %v816_v19 = vpop.f32.mrb[14].mxu0 }
  0xfc   :  { %v840_v20 = vpop.f32.mrb[14].mxu1  ;;  %v291_v21 = vpop.f32.mrb[15].mxu0  ;;  %v1287_v35 = vadd.f32 %v816_v19, %v1174_v38 }
  0xfd   :  { %v371_v22 = vpop.f32.mrb[15].mxu1  ;;  %v1292_v36 = vadd.f32 %v1174_v38, %v291_v21  ;;  %v1295_v37 = vadd.f32 %v840_v20, %v1174_v38 }
  0xfe   :  { %424 = vmax.xlane.f32.xlu0 %v1236_v18  ;;  %v1300_v39 = vadd.f32 %v1174_v38, %v371_v22 }
  0xff   :  { %426 = vmax.xlane.f32.xlu1 %v1231_v17 }
 0x102   :  { %396 = vmax.xlane.f32.xlu0 %v1244_v24 }
 0x103   :  { %398 = vmax.xlane.f32.xlu1 %v1239_v23 }
 0x106   :  { %428 = vmax.xlane.f32.xlu0 %v1252_v26 }
 0x107   :  { %430 = vmax.xlane.f32.xlu1 %v1247_v25 }
 0x10a   :  { %400 = vmax.xlane.f32.xlu0 %v1260_v28 }
 0x10b   :  { %402 = vmax.xlane.f32.xlu1 %v1255_v27 }
 0x10e   :  { %432 = vmax.xlane.f32.xlu0 %v1268_v30 }
 0x10f   :  { %434 = vmax.xlane.f32.xlu1 %v1263_v29 }
 0x112   :  { %404 = vmax.xlane.f32.xlu0 %v1276_v32 }
 0x113   :  { %406 = vmax.xlane.f32.xlu1 %v1271_v31 }
 0x116   :  { %436 = vmax.xlane.f32.xlu0 %v1284_v34 }
 0x117   :  { %438 = vmax.xlane.f32.xlu1 %v1279_v33 }
 0x11a   :  { %408 = vmax.xlane.f32.xlu0 %v1292_v36 }
 0x11b   :  { %410 = vmax.xlane.f32.xlu1 %v1287_v35 }
 0x11e   :  { %440 = vmax.xlane.f32.xlu0 %v1300_v39 }
 0x11f   :  { %442 = vmax.xlane.f32.xlu1 %v1295_v37 }
 0x16f   :  { %v383_v43 = vpop.xlane.xlu0 %382 }
 0x170   :  { %v415_v40 = vpop.xlane.xlu1 %414  ;;  %v445_v45 = vsub.f32 %v1177_v41, %v383_v43 }
 0x171   :  { %v461_v44 = vsub.f32 %v1180_v42, %v415_v40 }
 0x172   :  { %v478_v46 = vmul.f32 1.442695, %v445_v45 }
 0x173   :  { %v381_v50 = vpop.xlane.xlu0 %380  ;;  %v510_v52 = vmul.f32 1.442695, %v461_v44 }
 0x174   :  { %v387_v49 = vpop.xlane.xlu1 %386  ;;  %v444_v55 = vsub.f32 %v1185_v47, %v381_v50  ;;  %856 = vpow2.f32 %v478_v46 }
 0x175   :  { %v447_v53 = vsub.f32 %v1188_v48, %v387_v49  ;;  %858 = vpow2.f32 %v510_v52 }
 0x176   :  { %v476_v38 = vmul.f32 1.442695, %v444_v55 }
 0x177   :  { %v413_v57 = vpop.xlane.xlu0 %412  ;;  %v482_v58 = vmul.f32 1.442695, %v447_v53 }
 0x178   :  { %v419_v56 = vpop.xlane.xlu1 %418  ;;  %v460_v61 = vsub.f32 %v1196_v54, %v413_v57  ;;  %860 = vpow2.f32 %v476_v38 }
 0x179   :  { %v463_v42 = vsub.f32 %v1191_v51, %v419_v56  ;;  %862 = vpow2.f32 %v482_v58 }
 0x17a   :  { %v508_v41 = vmul.f32 1.442695, %v460_v61 }
 0x17b   :  { %v417_v1 = vpop.xlane.xlu0 %416  ;;  %v514_v48 = vmul.f32 1.442695, %v463_v42 }
 0x17c   :  { %v385_v62 = vpop.xlane.xlu1 %384  ;;  %864 = vpow2.f32 %v508_v41  ;;  %v462_v47 = vsub.f32 %v1204_v60, %v417_v1 }
 0x17d   :  { %v446_v2 = vsub.f32 %v1201_v59, %v385_v62 }
 0x17e   :  { %v1312_v4 = vpop.eup %856  ;;  %v512_v54 = vmul.f32 1.442695, %v462_v47 }
 0x17f   :  { %v480_v3 = vmul.f32 1.442695, %v446_v2  ;;  %v389_v8 = vpop.xlane.xlu0 %388  ;;  %542 = vadd.xlane.f32.xlu1 %v1312_v4  ;;  %v1317_v10 = vpop.eup %858 }
 0x180   :  { %v391_v7 = vpop.xlane.xlu1 %390  ;;  %v448_v9 = vsub.f32 %v1212_v0, %v389_v8 }
 0x181   :  { %866 = vpow2.f32 %v480_v3  ;;  %v449_v51 = vsub.f32 %v1207_v63, %v391_v7 }
 0x182   :  { %868 = vpow2.f32 %v514_v48  ;;  %v1319_v13 = vpop.eup %860  ;;  %v484_v63 = vmul.f32 1.442695, %v448_v9 }
 0x183   :  { %v486_v59 = vmul.f32 1.442695, %v449_v51  ;;  %v421_v14 = vpop.xlane.xlu0 %420  ;;  %574 = vadd.xlane.f32.xlu1 %v1317_v10  ;;  %540 = vadd.xlane.f32.xlu0 %v1319_v13  ;;  %v1325_v19 = vpop.eup %862 }
 0x184   :  { %v423_v60 = vpop.xlane.xlu1 %422  ;;  %v464_v16 = vsub.f32 %v1220_v6, %v421_v14 }
 0x185   :  { %870 = vpow2.f32 %v486_v59  ;;  %v465_v15 = vsub.f32 %v1215_v5, %v423_v60 }
 0x186   :  { %872 = vpow2.f32 %v512_v54  ;;  %v1327_v20 = vpop.eup %864  ;;  %v516_v5 = vmul.f32 1.442695, %v464_v16 }
 0x187   :  { %v518_v0 = vmul.f32 1.442695, %v465_v15  ;;  %v393_v22 = vpop.xlane.xlu0 %392  ;;  %546 = vadd.xlane.f32.xlu1 %v1325_v19  ;;  %572 = vadd.xlane.f32.xlu0 %v1327_v20 }
 0x188   :  { %v395_v21 = vpop.xlane.xlu1 %394  ;;  %v450_v43 = vsub.f32 %v1228_v12, %v393_v22 }
 0x189   :  { %874 = vpow2.f32 %v518_v0  ;;  %v451_v40 = vsub.f32 %v1223_v11, %v395_v21 }
 0x18a   :  { %876 = vpow2.f32 %v484_v63  ;;  %v488_v11 = vmul.f32 1.442695, %v450_v43 }
 0x18b   :  { %v1333_v44 = vpop.eup %866  ;;  %v490_v6 = vmul.f32 1.442695, %v451_v40  ;;  %v425_v49 = vpop.xlane.xlu0 %424 }
 0x18c   :  { %v1335_v45 = vpop.eup %868  ;;  %v427_v46 = vpop.xlane.xlu1 %426  ;;  %544 = vadd.xlane.f32.xlu0 %v1333_v44  ;;  %v466_v52 = vsub.f32 %v1236_v18, %v425_v49 }
 0x18d   :  { %878 = vpow2.f32 %v490_v6  ;;  %578 = vadd.xlane.f32.xlu1 %v1335_v45  ;;  %v467_v50 = vsub.f32 %v1231_v17, %v427_v46 }
 0x18e   :  { %880 = vpow2.f32 %v516_v5  ;;  %v520_v17 = vmul.f32 1.442695, %v466_v52 }
 0x18f   :  { %v1341_v53 = vpop.eup %870  ;;  %v522_v12 = vmul.f32 1.442695, %v467_v50  ;;  %v397_v56 = vpop.xlane.xlu0 %396 }
 0x190   :  { %v1343_v55 = vpop.eup %872  ;;  %v399_v38 = vpop.xlane.xlu1 %398  ;;  %v452_v58 = vsub.f32 %v1244_v24, %v397_v56 }
 0x191   :  { %882 = vpow2.f32 %v522_v12  ;;  %550 = vadd.xlane.f32.xlu1 %v1341_v53  ;;  %v453_v57 = vsub.f32 %v1239_v23, %v399_v38  ;;  %576 = vadd.xlane.f32.xlu0 %v1343_v55 }
 0x192   :  { %884 = vpow2.f32 %v488_v11  ;;  %v492_v23 = vmul.f32 1.442695, %v452_v58 }
 0x193   :  { %v1349_v61 = vpop.eup %874  ;;  %v494_v18 = vmul.f32 1.442695, %v453_v57  ;;  %v429_v62 = vpop.xlane.xlu0 %428 }
 0x194   :  { %v1351_v42 = vpop.eup %876  ;;  %v431_v41 = vpop.xlane.xlu1 %430  ;;  %v468_v2 = vsub.f32 %v1252_v26, %v429_v62 }
 0x195   :  { %886 = vpow2.f32 %v494_v18  ;;  %582 = vadd.xlane.f32.xlu1 %v1349_v61  ;;  %v469_v1 = vsub.f32 %v1247_v25, %v431_v41  ;;  %548 = vadd.xlane.f32.xlu0 %v1351_v42 }
 0x196   :  { %888 = vpow2.f32 %v520_v17  ;;  %v524_v25 = vmul.f32 1.442695, %v468_v2 }
 0x197   :  { %v1357_v48 = vpop.eup %878  ;;  %v526_v24 = vmul.f32 1.442695, %v469_v1  ;;  %v401_v7 = vpop.xlane.xlu0 %400 }
 0x198   :  { %v1359_v47 = vpop.eup %880  ;;  %v403_v3 = vpop.xlane.xlu1 %402  ;;  %v454_v51 = vsub.f32 %v1260_v28, %v401_v7 }
 0x199   :  { %890 = vpow2.f32 %v526_v24  ;;  %554 = vadd.xlane.f32.xlu1 %v1357_v48  ;;  %v455_v8 = vsub.f32 %v1255_v27, %v403_v3  ;;  %580 = vadd.xlane.f32.xlu0 %v1359_v47 }
 0x19a   :  { %892 = vpow2.f32 %v492_v23  ;;  %v496_v27 = vmul.f32 1.442695, %v454_v51 }
 0x19b   :  { %v1365_v54 = vpop.eup %882  ;;  %v498_v26 = vmul.f32 1.442695, %v455_v8  ;;  %v433_v60 = vpop.xlane.xlu0 %432 }
 0x19c   :  { %v1367_v9 = vpop.eup %884  ;;  %v435_v59 = vpop.xlane.xlu1 %434  ;;  %v470_v15 = vsub.f32 %v1268_v30, %v433_v60 }
 0x19d   :  { %894 = vpow2.f32 %v498_v26  ;;  %586 = vadd.xlane.f32.xlu1 %v1365_v54  ;;  %v471_v14 = vsub.f32 %v1263_v29, %v435_v59  ;;  %552 = vadd.xlane.f32.xlu0 %v1367_v9 }
 0x19e   :  { %896 = vpow2.f32 %v524_v25  ;;  %v528_v29 = vmul.f32 1.442695, %v470_v15 }
 0x19f   :  { %v1373_v63 = vpop.eup %886  ;;  %v530_v28 = vmul.f32 1.442695, %v471_v14  ;;  %v405_v21 = vpop.xlane.xlu0 %404 }
 0x1a0   :  { %v1375_v16 = vpop.eup %888  ;;  %v407_v0 = vpop.xlane.xlu1 %406  ;;  %v456_v40 = vsub.f32 %v1276_v32, %v405_v21 }
 0x1a1   :  { %898 = vpow2.f32 %v530_v28  ;;  %558 = vadd.xlane.f32.xlu1 %v1373_v63  ;;  %v457_v22 = vsub.f32 %v1271_v31, %v407_v0  ;;  %584 = vadd.xlane.f32.xlu0 %v1375_v16 }
 0x1a2   :  { %900 = vpow2.f32 %v496_v27  ;;  %v500_v31 = vmul.f32 1.442695, %v456_v40 }
 0x1a3   :  { %v1381_v5 = vpop.eup %890  ;;  %v502_v30 = vmul.f32 1.442695, %v457_v22  ;;  %v437_v46 = vpop.xlane.xlu0 %436 }
 0x1a4   :  { %v1383_v43 = vpop.eup %892  ;;  %v439_v6 = vpop.xlane.xlu1 %438  ;;  %v472_v50 = vsub.f32 %v1284_v34, %v437_v46 }
 0x1a5   :  { %902 = vpow2.f32 %v502_v30  ;;  %590 = vadd.xlane.f32.xlu1 %v1381_v5  ;;  %v473_v49 = vsub.f32 %v1279_v33, %v439_v6  ;;  %556 = vadd.xlane.f32.xlu0 %v1383_v43 }
 0x1a6   :  { %904 = vpow2.f32 %v528_v29  ;;  %v532_v33 = vmul.f32 1.442695, %v472_v50 }
 0x1a7   :  { %v1389_v11 = vpop.eup %894  ;;  %v534_v32 = vmul.f32 1.442695, %v473_v49  ;;  %v409_v38 = vpop.xlane.xlu0 %408 }
 0x1a8   :  { %v1391_v52 = vpop.eup %896  ;;  %v411_v12 = vpop.xlane.xlu1 %410  ;;  %v458_v57 = vsub.f32 %v1292_v36, %v409_v38 }
 0x1a9   :  { %906 = vpow2.f32 %v534_v32  ;;  %562 = vadd.xlane.f32.xlu1 %v1389_v11  ;;  %v459_v56 = vsub.f32 %v1287_v35, %v411_v12  ;;  %588 = vadd.xlane.f32.xlu0 %v1391_v52 }
 0x1aa   :  { %908 = vpow2.f32 %v500_v31  ;;  %v504_v35 = vmul.f32 1.442695, %v458_v57 }
 0x1ab   :  { %v1397_v17 = vpop.eup %898  ;;  %v506_v34 = vmul.f32 1.442695, %v459_v56  ;;  %v441_v41 = vpop.xlane.xlu0 %440 }
 0x1ac   :  { %v1399_v58 = vpop.eup %900  ;;  %v443_v18 = vpop.xlane.xlu1 %442  ;;  %v474_v1 = vsub.f32 %v1300_v39, %v441_v41 }
 0x1ad   :  { %910 = vpow2.f32 %v506_v34  ;;  %594 = vadd.xlane.f32.xlu1 %v1397_v17  ;;  %v475_v62 = vsub.f32 %v1295_v37, %v443_v18  ;;  %560 = vadd.xlane.f32.xlu0 %v1399_v58 }
 0x1ae   :  { %912 = vpow2.f32 %v532_v33  ;;  %v536_v24 = vmul.f32 1.442695, %v474_v1 }
 0x1af   :  { %v1405_v23 = vpop.eup %902  ;;  %v538_v36 = vmul.f32 1.442695, %v475_v62 }
 0x1b0   :  { %v1407_v2 = vpop.eup %904 }
 0x1b1   :  { %914 = vpow2.f32 %v538_v36  ;;  %566 = vadd.xlane.f32.xlu1 %v1405_v23  ;;  %592 = vadd.xlane.f32.xlu0 %v1407_v2 }
 0x1b2   :  { %916 = vpow2.f32 %v504_v35 }
 0x1b3   :  { %v1411_v3 = vpop.eup %906  ;;  %918 = vpow2.f32 %v536_v24 }
 0x1b4   :  { %v1413_v37 = vpop.eup %908 }
 0x1b5   :  { %598 = vadd.xlane.f32.xlu1 %v1411_v3  ;;  %564 = vadd.xlane.f32.xlu0 %v1413_v37 }
 0x1b7   :  { %v1417_v39 = vpop.eup %910 }
 0x1b8   :  { %v1419_v7 = vpop.eup %912 }
 0x1b9   :  { %570 = vadd.xlane.f32.xlu1 %v1417_v39  ;;  %596 = vadd.xlane.f32.xlu0 %v1419_v7 }
 0x1bb   :  { %v1423_v8 = vpop.eup %914 }
 0x1bc   :  { %v1425_v25 = vpop.eup %916 }
 0x1bd   :  { %602 = vadd.xlane.f32.xlu1 %v1423_v8  ;;  %568 = vadd.xlane.f32.xlu0 %v1425_v25  ;;  %v1429_v51 = vpop.eup %918 }
 0x1c1   :  { %600 = vadd.xlane.f32.xlu0 %v1429_v51 }
 0x20c   :  { %v543_v26 = vpop.xlane.xlu1 %542 }
 0x20d   :  { %920 = vrcp.f32 %v543_v26 }
 0x210   :  { %v575_v59 = vpop.xlane.xlu1 %574  ;;  %v541_v60 = vpop.xlane.xlu0 %540 }
 0x211   :  { %922 = vrcp.f32 %v575_v59 }
 0x212   :  { %924 = vrcp.f32 %v541_v60 }
 0x214   :  { %v547_v14 = vpop.xlane.xlu1 %546  ;;  %v573_v27 = vpop.xlane.xlu0 %572 }
 0x215   :  { %926 = vrcp.f32 %v547_v14 }
 0x216   :  { %928 = vrcp.f32 %v573_v27 }
 0x217   :  { %v921_v15 = vpop.eup %920 }
 0x218   :  { %v607_v28 = vmul.f32 %v921_v15, %v1312_v4 }
 0x219   :  { %v545_v21 = vpop.xlane.xlu0 %544 }
 0x21a   :  { %v579_v0 = vpop.xlane.xlu1 %578  ;;  %669 = vst [vmem:[#allocation2 + $0x8] sm:$0xff] %v607_v28 }
 0x21b   :  { %930 = vrcp.f32 %v579_v0  ;;  %v923_v22 = vpop.eup %922 }
 0x21c   :  { %932 = vrcp.f32 %v545_v21  ;;  %v925_v29 = vpop.eup %924  ;;  %v639_v40 = vmul.f32 %v923_v22, %v1317_v10 }
 0x21d   :  { %v605_v46 = vmul.f32 %v925_v29, %v1319_v13 }
 0x21e   :  { %v551_v30 = vpop.xlane.xlu1 %550  ;;  %v577_v6 = vpop.xlane.xlu0 %576  ;;  %685 = vst [vmem:[#allocation2 + $0x88] sm:$0xff] %v639_v40 }
 0x21f   :  { %934 = vrcp.f32 %v551_v30  ;;  %v927_v49 = vpop.eup %926  ;;  %668 = vst [vmem:[#allocation2] sm:$0xff] %v605_v46 }
 0x220   :  { %936 = vrcp.f32 %v577_v6  ;;  %v929_v31 = vpop.eup %928  ;;  %v611_v4 = vmul.f32 %v927_v49, %v1325_v19 }
 0x221   :  { %v637_v12 = vmul.f32 %v929_v31, %v1327_v20 }
 0x222   :  { %v583_v50 = vpop.xlane.xlu1 %582  ;;  %v549_v32 = vpop.xlane.xlu0 %548  ;;  %671 = vst [vmem:[#allocation2 + $0x18] sm:$0xff] %v611_v4 }
 0x223   :  { %938 = vrcp.f32 %v583_v50  ;;  %684 = vst [vmem:[#allocation2 + $0x80] sm:$0xff] %v637_v12 }
 0x224   :  { %940 = vrcp.f32 %v549_v32 }
 0x225   :  { %v931_v10 = vpop.eup %930 }
 0x226   :  { %v933_v38 = vpop.eup %932  ;;  %v643_v13 = vmul.f32 %v931_v10, %v1335_v45  ;;  %v555_v56 = vpop.xlane.xlu1 %554 }
 0x227   :  { %v581_v33 = vpop.xlane.xlu0 %580  ;;  %v609_v57 = vmul.f32 %v933_v38, %v1333_v44  ;;  %942 = vrcp.f32 %v555_v56 }
 0x228   :  { %687 = vst [vmem:[#allocation2 + $0x98] sm:$0xff] %v643_v13  ;;  %944 = vrcp.f32 %v581_v33 }
 0x229   :  { %v935_v19 = vpop.eup %934  ;;  %670 = vst [vmem:[#allocation2 + $0x10] sm:$0xff] %v609_v57 }
 0x22a   :  { %v937_v34 = vpop.eup %936  ;;  %v615_v20 = vmul.f32 %v935_v19, %v1341_v53  ;;  %v587_v18 = vpop.xlane.xlu1 %586 }
 0x22b   :  { %v553_v41 = vpop.xlane.xlu0 %552  ;;  %v641_v62 = vmul.f32 %v937_v34, %v1343_v55  ;;  %946 = vrcp.f32 %v587_v18 }
 0x22c   :  { %673 = vst [vmem:[#allocation2 + $0x28] sm:$0xff] %v615_v20  ;;  %948 = vrcp.f32 %v553_v41 }
 0x22d   :  { %v939_v45 = vpop.eup %938  ;;  %686 = vst [vmem:[#allocation2 + $0x90] sm:$0xff] %v641_v62 }
 0x22e   :  { %v941_v35 = vpop.eup %940  ;;  %v647_v44 = vmul.f32 %v939_v45, %v1349_v61  ;;  %v559_v1 = vpop.xlane.xlu1 %558 }
 0x22f   :  { %v585_v36 = vpop.xlane.xlu0 %584  ;;  %v613_v24 = vmul.f32 %v941_v35, %v1351_v42  ;;  %950 = vrcp.f32 %v559_v1 }
 0x230   :  { %689 = vst [vmem:[#allocation2 + $0xa8] sm:$0xff] %v647_v44  ;;  %952 = vrcp.f32 %v585_v36 }
 0x231   :  { %v943_v53 = vpop.eup %942  ;;  %672 = vst [vmem:[#allocation2 + $0x20] sm:$0xff] %v613_v24 }
 0x232   :  { %v945_v26 = vpop.eup %944  ;;  %v619_v55 = vmul.f32 %v943_v53, %v1357_v48  ;;  %v591_v59 = vpop.xlane.xlu1 %590 }
 0x233   :  { %v557_v60 = vpop.xlane.xlu0 %556  ;;  %v645_v14 = vmul.f32 %v945_v26, %v1359_v47  ;;  %954 = vrcp.f32 %v591_v59 }
 0x234   :  { %675 = vst [vmem:[#allocation2 + $0x38] sm:$0xff] %v619_v55  ;;  %956 = vrcp.f32 %v557_v60 }
 0x235   :  { %v947_v61 = vpop.eup %946  ;;  %688 = vst [vmem:[#allocation2 + $0xa0] sm:$0xff] %v645_v14 }
 0x236   :  { %v949_v27 = vpop.eup %948  ;;  %v651_v42 = vmul.f32 %v947_v61, %v1365_v54  ;;  %v563_v15 = vpop.xlane.xlu1 %562 }
 0x237   :  { %v589_v28 = vpop.xlane.xlu0 %588  ;;  %v617_v0 = vmul.f32 %v949_v27, %v1367_v9  ;;  %958 = vrcp.f32 %v563_v15 }
 0x238   :  { %691 = vst [vmem:[#allocation2 + $0xb8] sm:$0xff] %v651_v42  ;;  %960 = vrcp.f32 %v589_v28 }
 0x239   :  { %v951_v48 = vpop.eup %950  ;;  %674 = vst [vmem:[#allocation2 + $0x30] sm:$0xff] %v617_v0 }
 0x23a   :  { %v953_v21 = vpop.eup %952  ;;  %v623_v47 = vmul.f32 %v951_v48, %v1373_v63  ;;  %v595_v22 = vpop.xlane.xlu1 %594 }
 0x23b   :  { %v561_v29 = vpop.xlane.xlu0 %560  ;;  %v649_v40 = vmul.f32 %v953_v21, %v1375_v16  ;;  %962 = vrcp.f32 %v595_v22 }
 0x23c   :  { %677 = vst [vmem:[#allocation2 + $0x48] sm:$0xff] %v623_v47  ;;  %964 = vrcp.f32 %v561_v29 }
 0x23d   :  { %v955_v54 = vpop.eup %954  ;;  %690 = vst [vmem:[#allocation2 + $0xb0] sm:$0xff] %v649_v40 }
 0x23e   :  { %v957_v30 = vpop.eup %956  ;;  %v655_v9 = vmul.f32 %v955_v54, %v1381_v5  ;;  %v567_v6 = vpop.xlane.xlu1 %566 }
 0x23f   :  { %v593_v46 = vpop.xlane.xlu0 %592  ;;  %v621_v49 = vmul.f32 %v957_v30, %v1383_v43  ;;  %966 = vrcp.f32 %v567_v6 }
 0x240   :  { %693 = vst [vmem:[#allocation2 + $0xc8] sm:$0xff] %v655_v9  ;;  %968 = vrcp.f32 %v593_v46 }
 0x241   :  { %v959_v63 = vpop.eup %958  ;;  %676 = vst [vmem:[#allocation2 + $0x40] sm:$0xff] %v621_v49 }
 0x242   :  { %v961_v31 = vpop.eup %960  ;;  %v627_v16 = vmul.f32 %v959_v63, %v1389_v11  ;;  %v599_v4 = vpop.xlane.xlu1 %598 }
 0x243   :  { %v565_v50 = vpop.xlane.xlu0 %564  ;;  %v653_v32 = vmul.f32 %v961_v31, %v1391_v52  ;;  %970 = vrcp.f32 %v599_v4 }
 0x244   :  { %679 = vst [vmem:[#allocation2 + $0x58] sm:$0xff] %v627_v16  ;;  %972 = vrcp.f32 %v565_v50 }
 0x245   :  { %v963_v5 = vpop.eup %962  ;;  %692 = vst [vmem:[#allocation2 + $0xc0] sm:$0xff] %v653_v32 }
 0x246   :  { %v965_v12 = vpop.eup %964  ;;  %v659_v43 = vmul.f32 %v963_v5, %v1397_v17  ;;  %v571_v10 = vpop.xlane.xlu1 %570 }
 0x247   :  { %v597_v38 = vpop.xlane.xlu0 %596  ;;  %v625_v13 = vmul.f32 %v965_v12, %v1399_v58  ;;  %974 = vrcp.f32 %v571_v10 }
 0x248   :  { %695 = vst [vmem:[#allocation2 + $0xd8] sm:$0xff] %v659_v43  ;;  %976 = vrcp.f32 %v597_v38 }
 0x249   :  { %v967_v11 = vpop.eup %966  ;;  %678 = vst [vmem:[#allocation2 + $0x50] sm:$0xff] %v625_v13 }
 0x24a   :  { %v969_v56 = vpop.eup %968  ;;  %v631_v52 = vmul.f32 %v967_v11, %v1405_v23  ;;  %v603_v33 = vpop.xlane.xlu1 %602 }
 0x24b   :  { %v569_v57 = vpop.xlane.xlu0 %568  ;;  %v657_v19 = vmul.f32 %v969_v56, %v1407_v2  ;;  %978 = vrcp.f32 %v603_v33 }
 0x24c   :  { %681 = vst [vmem:[#allocation2 + $0x68] sm:$0xff] %v631_v52  ;;  %980 = vrcp.f32 %v569_v57 }
 0x24d   :  { %v971_v17 = vpop.eup %970  ;;  %694 = vst [vmem:[#allocation2 + $0xd0] sm:$0xff] %v657_v19 }
 0x24e   :  { %v973_v34 = vpop.eup %972  ;;  %v663_v58 = vmul.f32 %v971_v17, %v1411_v3 }
 0x24f   :  { %v601_v20 = vpop.xlane.xlu0 %600  ;;  %v629_v18 = vmul.f32 %v973_v34, %v1413_v37 }
 0x250   :  { %982 = vrcp.f32 %v601_v20  ;;  %697 = vst [vmem:[#allocation2 + $0xe8] sm:$0xff] %v663_v58 }
 0x251   :  { %v975_v41 = vpop.eup %974  ;;  %680 = vst [vmem:[#allocation2 + $0x60] sm:$0xff] %v629_v18 }
 0x252   :  { %v977_v23 = vpop.eup %976  ;;  %v635_v62 = vmul.f32 %v975_v41, %v1417_v39 }
 0x253   :  { %v661_v2 = vmul.f32 %v977_v23, %v1419_v7 }
 0x254   :  { %683 = vst [vmem:[#allocation2 + $0x78] sm:$0xff] %v635_v62 }
 0x255   :  { %v979_v45 = vpop.eup %978  ;;  %696 = vst [vmem:[#allocation2 + $0xe0] sm:$0xff] %v661_v2 }
 0x256   :  { %v981_v35 = vpop.eup %980  ;;  %v667_v44 = vmul.f32 %v979_v45, %v1423_v8 }
 0x257   :  { %v633_v3 = vmul.f32 %v981_v35, %v1425_v25 }
 0x258   :  { %699 = vst [vmem:[#allocation2 + $0xf8] sm:$0xff] %v667_v44 }
 0x259   :  { %682 = vst [vmem:[#allocation2 + $0x70] sm:$0xff] %v633_v3 }
 0x25a   :  { %v983_v37 = vpop.eup %982 }
 0x25b   :  { %v665_v1 = vmul.f32 %v983_v37, %v1429_v51 }
 0x25d   :  { %698 = vst [vmem:[#allocation2 + $0xf0] sm:$0xff] %v665_v1 }
 0x25e   :  { %995 = shalt.err (!%p992_p4)
}
 0x25f   :  { %s996_s5 = scalar_lea.hbm %s1479_s3, 4096 }
 0x260   :  { %p997_p5 = scmp.ne.s32.totalorder %s1479_s3, %s996_s5  ;;  %p1000_p6 = scmp.lt.u32.totalorder %s996_s5, %s1479_s3 }
 0x262   :  { %p1002_p7 = pnand %p1000_p6, %p997_p5 }
 0x264   :  { %1005 = shalt.err (!%p1002_p7)
}
 0x265   :  { %s1009_s10 = smov 128   ;;  %s1010_s11 = smov 8  }
 0x266   :  { %711 = dma.vmem_to_hbm [thread:$0]  %s706_s2, 4096, %s1479_s3, [#allocation3], %s1009_s10, %s1009_s10, %s1010_s11  }
 0x267   :  { %1006 = dma.done.wait [#allocation3], 4096  }
 0x268   :  { %1007 = vsyncadd [#allocation3], 4294963200 }
 0x269   :  { %715 = vsyncpa [#allocation3], 1 }

// kernel: tpu_custom_call.1
= control target key start
LH: loop header
LB: loop body
LE: loop exit
PB: predicated region body
PF: predicated region fallthrough
CT: control target
= control target key end

     0   :  { %vm58_vm0 = vcmask 261120   ;;  %s1476_s0 = inlined_call_operand.vmem [shape: f32[256,32], index: 0, kind: input, shape index: {}]   ;;  %s1477_s1 = inlined_call_operand.vmem [shape: f32[32,128], index: 1, kind: input, shape index: {}]   ;;  %s1478_s2 = inlined_call_operand.vmem [shape: f32[1,128], index: 2, kind: input, shape index: {}]   ;;  %s1479_s3 = inlined_call_operand.hbm [shape: f32[256,128], index: 3, kind: output, shape index: {}]  }
   0x1   :  { %v47_v0 = vld [vmem:[%s1477_s1] sm:$0xff]  ;;  %v48_v1 = vld [vmem:[%s1477_s1 + $0x8] sm:$0xff]  ;;  %v49_v2 = vld [vmem:[%s1477_s1 + $0x10] sm:$0xff] }
   0x2   :  { %v841_v3 = vpack.c.bf16 %v48_v1, %v47_v0  ;;  %v50_v4 = vld [vmem:[%s1477_s1 + $0x18] sm:$0xff]  ;;  %v15_v5 = vld [vmem:[%s1476_s0] sm:$0xff]  ;;  %v16_v8 = vld [vmem:[%s1476_s0 + $0x8] sm:$0xff] }
   0x3   :  { %v31_v6 = vld [vmem:[%s1476_s0 + $0x80] sm:$0xff]  ;;  %v845_v7 = vpack.c.bf16 %v50_v4, %v49_v2  ;;  %793 = vmatprep.mubr.msk.f32.mxu0 %vm58_vm0, %v15_v5  ;;  %v32_v9 = vld [vmem:[%s1476_s0 + $0x88] sm:$0xff]  ;;  %v17_v10 = vld [vmem:[%s1476_s0 + $0x10] sm:$0xff] }
   0x4   :  { %817 = vmatprep.mubr.msk.f32.mxu1 %vm58_vm0, %v31_v6  ;;  %842 = vmatprep.subr.bf16.mxu0 %v841_v3  ;;  %v33_v11 = vld [vmem:[%s1476_s0 + $0x90] sm:$0xff]  ;;  %v18_v12 = vld [vmem:[%s1476_s0 + $0x18] sm:$0xff] }
   0x5   :  { %849 = vmatprep.subr.bf16.mxu1 %v841_v3  ;;  %844 = vmatpush3.bf16.msra.mxu0 %v841_v3  ;;  %v34_v13 = vld [vmem:[%s1476_s0 + $0x98] sm:$0xff] }
   0x6   :  { %851 = vmatpush3.bf16.msra.mxu1 %v841_v3  ;;  %846 = vmatprep.subr.bf16.mxu0 %v845_v7 }
   0x7   :  { %850 = vmatprep.subr.bf16.mxu1 %v845_v7 }
   0x9   :  { %848 = vmatpush3.bf16.msra.mxu0 %v845_v7 }
   0xa   :  { %852 = vmatpush3.bf16.msra.mxu1 %v845_v7 }
   0xc   :  { %794 = vmatmul.mubr.msk.f32.vlgmr.msra.gmra.mrb[0].mxu0 %vm58_vm0, %v16_v8 }
   0xd   :  { %818 = vmatmul.mubr.msk.f32.vlgmr.msra.gmra.mrb[0].mxu1 %vm58_vm0, %v32_v9  ;;  %796 = vmatprep.mubr.msk.f32.mxu0 %vm58_vm0, %v17_v10 }
   0xe   :  { %820 = vmatprep.mubr.msk.f32.mxu1 %vm58_vm0, %v33_v11 }
   0xf   :  { %8 = vsyncpa [#allocation3], 0  ;;  %v19_v14 = vld [vmem:[%s1476_s0 + $0x20] sm:$0xff]  ;;  %v20_v16 = vld [vmem:[%s1476_s0 + $0x28] sm:$0xff] }
  0x10   :  { %v35_v15 = vld [vmem:[%s1476_s0 + $0xa0] sm:$0xff]  ;;  %797 = vmatmul.mubr.msk.f32.gmra.mrb[2].mxu0 %vm58_vm0, %v18_v12  ;;  %v36_v17 = vld [vmem:[%s1476_s0 + $0xa8] sm:$0xff]  ;;  %v21_v18 = vld [vmem:[%s1476_s0 + $0x30] sm:$0xff] }
  0x11   :  { %821 = vmatmul.mubr.msk.f32.gmra.mrb[2].mxu1 %vm58_vm0, %v34_v13  ;;  %799 = vmatprep.mubr.msk.f32.mxu0 %vm58_vm0, %v19_v14  ;;  %v37_v19 = vld [vmem:[%s1476_s0 + $0xb0] sm:$0xff]  ;;  %v22_v20 = vld [vmem:[%s1476_s0 + $0x38] sm:$0xff]  ;;  %v23_v22 = vld [vmem:[%s1476_s0 + $0x40] sm:$0xff] }
  0x12   :  { %823 = vmatprep.mubr.msk.f32.mxu1 %vm58_vm0, %v35_v15  ;;  %v38_v21 = vld [vmem:[%s1476_s0 + $0xb8] sm:$0xff]  ;;  %v39_v23 = vld [vmem:[%s1476_s0 + $0xc0] sm:$0xff]  ;;  %v24_v24 = vld [vmem:[%s1476_s0 + $0x48] sm:$0xff] }
  0x13   :  { %v40_v25 = vld [vmem:[%s1476_s0 + $0xc8] sm:$0xff]  ;;  %v25_v26 = vld [vmem:[%s1476_s0 + $0x50] sm:$0xff]  ;;  %v26_v28 = vld [vmem:[%s1476_s0 + $0x58] sm:$0xff] }
  0x14   :  { %800 = vmatmul.mubr.msk.f32.gmra.mrb[4].mxu0 %vm58_vm0, %v20_v16  ;;  %v41_v27 = vld [vmem:[%s1476_s0 + $0xd0] sm:$0xff]  ;;  %v42_v29 = vld [vmem:[%s1476_s0 + $0xd8] sm:$0xff]  ;;  %v27_v30 = vld [vmem:[%s1476_s0 + $0x60] sm:$0xff] }
  0x15   :  { %824 = vmatmul.mubr.msk.f32.gmra.mrb[4].mxu1 %vm58_vm0, %v36_v17  ;;  %802 = vmatprep.mubr.msk.f32.mxu0 %vm58_vm0, %v21_v18  ;;  %v43_v31 = vld [vmem:[%s1476_s0 + $0xe0] sm:$0xff]  ;;  %v28_v32 = vld [vmem:[%s1476_s0 + $0x68] sm:$0xff]  ;;  %v29_v34 = vld [vmem:[%s1476_s0 + $0x70] sm:$0xff] }
  0x16   :  { %826 = vmatprep.mubr.msk.f32.mxu1 %vm58_vm0, %v37_v19  ;;  %v44_v33 = vld [vmem:[%s1476_s0 + $0xe8] sm:$0xff]  ;;  %v45_v35 = vld [vmem:[%s1476_s0 + $0xf0] sm:$0xff]  ;;  %v30_v36 = vld [vmem:[%s1476_s0 + $0x78] sm:$0xff] }
  0x17   :  { %v46_v37 = vld [vmem:[%s1476_s0 + $0xf8] sm:$0xff]  ;;  %v1174_v38 = vld [vmem:[%s1478_s2] ss:$0 sm:$0xff]  ;;  %s1008_s0 = smov [#allocation2]  }
  0x18   :  { %803 = vmatmul.mubr.msk.f32.gmra.mrb[6].mxu0 %vm58_vm0, %v22_v20  ;;  %s705_s2 = sshll.u32 %s1008_s0, 4  ;;  %s706_s2 = int_to_ptr.vmem [resolvable:$true] %s705_s2 }
  0x19   :  { %827 = vmatmul.mubr.msk.f32.gmra.mrb[6].mxu1 %vm58_vm0, %v38_v21  ;;  %805 = vmatprep.mubr.msk.f32.mxu0 %vm58_vm0, %v23_v22  ;;  %s984_s29 = scalar_lea.vmem %s706_s2, 4096  ;;  %p989_p1 = scmp.lt.s32.totalorder %s706_s2, %s706_s2 }
  0x1a   :  { %829 = vmatprep.mubr.msk.f32.mxu1 %vm58_vm0, %v39_v23  ;;  %p985_p0 = scmp.ne.s32.totalorder %s706_s2, %s984_s29  ;;  %p990_p2 = scmp.lt.s32.totalorder %s984_s29, %s984_s29 }
  0x1c   :  { %806 = vmatmul.mubr.msk.f32.gmra.mrb[8].mxu0 %vm58_vm0, %v24_v24  ;;  %p991_p3 = por %p990_p2, %p989_p1 }
  0x1d   :  { %830 = vmatmul.mubr.msk.f32.gmra.mrb[8].mxu1 %vm58_vm0, %v40_v25  ;;  %808 = vmatprep.mubr.msk.f32.mxu0 %vm58_vm0, %v25_v26 }
  0x1e   :  { %832 = vmatprep.mubr.msk.f32.mxu1 %vm58_vm0, %v41_v27  ;;  %p992_p4 = pnand %p991_p3, %p985_p0 }
  0x20   :  { %809 = vmatmul.mubr.msk.f32.gmra.mrb[10].mxu0 %vm58_vm0, %v26_v28 }
  0x21   :  { %833 = vmatmul.mubr.msk.f32.gmra.mrb[10].mxu1 %vm58_vm0, %v42_v29  ;;  %811 = vmatprep.mubr.msk.f32.mxu0 %vm58_vm0, %v27_v30 }
  0x22   :  { %835 = vmatprep.mubr.msk.f32.mxu1 %vm58_vm0, %v43_v31 }
  0x24   :  { %812 = vmatmul.mubr.msk.f32.gmra.mrb[12].mxu0 %vm58_vm0, %v28_v32 }
  0x25   :  { %836 = vmatmul.mubr.msk.f32.gmra.mrb[12].mxu1 %vm58_vm0, %v44_v33  ;;  %814 = vmatprep.mubr.msk.f32.mxu0 %vm58_vm0, %v29_v34 }
  0x26   :  { %838 = vmatprep.mubr.msk.f32.mxu1 %vm58_vm0, %v45_v35 }
  0x28   :  { %815 = vmatmul.mubr.msk.f32.gmra.mrb[14].mxu0 %vm58_vm0, %v30_v36 }
  0x29   :  { %839 = vmatmul.mubr.msk.f32.gmra.mrb[14].mxu1 %vm58_vm0, %v46_v37 }
  0xdf   :  { %v795_v39 = vpop.f32.mrb[0].mxu0 }
  0xe0   :  { %v819_v40 = vpop.f32.mrb[0].mxu1  ;;  %v1177_v41 = vadd.f32 %v795_v39, %v1174_v38  ;;  %v221_v43 = vpop.f32.mrb[1].mxu0 }
  0xe1   :  { %v1180_v42 = vadd.f32 %v819_v40, %v1174_v38  ;;  %v301_v44 = vpop.f32.mrb[1].mxu1  ;;  %v1185_v47 = vadd.f32 %v1174_v38, %v221_v43 }
  0xe2   :  { %382 = vmax.xlane.f32.xlu0 %v1177_v41  ;;  %v1196_v54 = vadd.f32 %v1174_v38, %v301_v44 }
  0xe3   :  { %414 = vmax.xlane.f32.xlu1 %v1180_v42  ;;  %v798_v45 = vpop.f32.mrb[2].mxu0 }
  0xe4   :  { %v822_v46 = vpop.f32.mrb[2].mxu1  ;;  %v1188_v48 = vadd.f32 %v798_v45, %v1174_v38  ;;  %v231_v49 = vpop.f32.mrb[3].mxu0 }
  0xe5   :  { %v311_v50 = vpop.f32.mrb[3].mxu1  ;;  %v1191_v51 = vadd.f32 %v822_v46, %v1174_v38  ;;  %v1201_v59 = vadd.f32 %v1174_v38, %v231_v49 }
  0xe6   :  { %380 = vmax.xlane.f32.xlu0 %v1185_v47  ;;  %v1204_v60 = vadd.f32 %v1174_v38, %v311_v50 }
  0xe7   :  { %386 = vmax.xlane.f32.xlu1 %v1188_v48  ;;  %v801_v52 = vpop.f32.mrb[4].mxu0 }
  0xe8   :  { %v825_v53 = vpop.f32.mrb[4].mxu1  ;;  %v241_v55 = vpop.f32.mrb[5].mxu0  ;;  %v1207_v63 = vadd.f32 %v801_v52, %v1174_v38 }
  0xe9   :  { %v321_v56 = vpop.f32.mrb[5].mxu1  ;;  %v1212_v0 = vadd.f32 %v1174_v38, %v241_v55  ;;  %v1215_v5 = vadd.f32 %v825_v53, %v1174_v38 }
  0xea   :  { %412 = vmax.xlane.f32.xlu0 %v1196_v54  ;;  %v1220_v6 = vadd.f32 %v1174_v38, %v321_v56 }
  0xeb   :  { %418 = vmax.xlane.f32.xlu1 %v1191_v51  ;;  %v804_v57 = vpop.f32.mrb[6].mxu0 }
  0xec   :  { %v828_v58 = vpop.f32.mrb[6].mxu1  ;;  %v251_v61 = vpop.f32.mrb[7].mxu0  ;;  %v1223_v11 = vadd.f32 %v804_v57, %v1174_v38 }
  0xed   :  { %v331_v62 = vpop.f32.mrb[7].mxu1  ;;  %v1228_v12 = vadd.f32 %v1174_v38, %v251_v61  ;;  %v1231_v17 = vadd.f32 %v828_v58, %v1174_v38 }
  0xee   :  { %416 = vmax.xlane.f32.xlu0 %v1204_v60  ;;  %v1236_v18 = vadd.f32 %v1174_v38, %v331_v62 }
  0xef   :  { %384 = vmax.xlane.f32.xlu1 %v1201_v59  ;;  %v807_v1 = vpop.f32.mrb[8].mxu0 }
  0xf0   :  { %v831_v2 = vpop.f32.mrb[8].mxu1  ;;  %v261_v3 = vpop.f32.mrb[9].mxu0  ;;  %v1239_v23 = vadd.f32 %v807_v1, %v1174_v38 }
  0xf1   :  { %v341_v4 = vpop.f32.mrb[9].mxu1  ;;  %v1244_v24 = vadd.f32 %v1174_v38, %v261_v3  ;;  %v1247_v25 = vadd.f32 %v831_v2, %v1174_v38 }
  0xf2   :  { %388 = vmax.xlane.f32.xlu0 %v1212_v0  ;;  %v1252_v26 = vadd.f32 %v1174_v38, %v341_v4 }
  0xf3   :  { %390 = vmax.xlane.f32.xlu1 %v1207_v63  ;;  %v810_v7 = vpop.f32.mrb[10].mxu0 }
  0xf4   :  { %v834_v8 = vpop.f32.mrb[10].mxu1  ;;  %v271_v9 = vpop.f32.mrb[11].mxu0  ;;  %v1255_v27 = vadd.f32 %v810_v7, %v1174_v38 }
  0xf5   :  { %v351_v10 = vpop.f32.mrb[11].mxu1  ;;  %v1260_v28 = vadd.f32 %v1174_v38, %v271_v9  ;;  %v1263_v29 = vadd.f32 %v834_v8, %v1174_v38 }
  0xf6   :  { %420 = vmax.xlane.f32.xlu0 %v1220_v6  ;;  %v1268_v30 = vadd.f32 %v1174_v38, %v351_v10 }
  0xf7   :  { %422 = vmax.xlane.f32.xlu1 %v1215_v5  ;;  %v813_v13 = vpop.f32.mrb[12].mxu0 }
  0xf8   :  { %v837_v14 = vpop.f32.mrb[12].mxu1  ;;  %v281_v15 = vpop.f32.mrb[13].mxu0  ;;  %v1271_v31 = vadd.f32 %v813_v13, %v1174_v38 }
  0xf9   :  { %v361_v16 = vpop.f32.mrb[13].mxu1  ;;  %v1276_v32 = vadd.f32 %v1174_v38, %v281_v15  ;;  %v1279_v33 = vadd.f32 %v837_v14, %v1174_v38 }
  0xfa   :  { %392 = vmax.xlane.f32.xlu0 %v1228_v12  ;;  %v1284_v34 = vadd.f32 %v1174_v38, %v361_v16 }
  0xfb   :  { %394 = vmax.xlane.f32.xlu1 %v1223_v11  ;;  %v816_v19 = vpop.f32.mrb[14].mxu0 }
  0xfc   :  { %v840_v20 = vpop.f32.mrb[14].mxu1  ;;  %v291_v21 = vpop.f32.mrb[15].mxu0  ;;  %v1287_v35 = vadd.f32 %v816_v19, %v1174_v38 }
  0xfd   :  { %v371_v22 = vpop.f32.mrb[15].mxu1  ;;  %v1292_v36 = vadd.f32 %v1174_v38, %v291_v21  ;;  %v1295_v37 = vadd.f32 %v840_v20, %v1174_v38 }
  0xfe   :  { %424 = vmax.xlane.f32.xlu0 %v1236_v18  ;;  %v1300_v39 = vadd.f32 %v1174_v38, %v371_v22 }
  0xff   :  { %426 = vmax.xlane.f32.xlu1 %v1231_v17 }
 0x102   :  { %396 = vmax.xlane.f32.xlu0 %v1244_v24 }
 0x103   :  { %398 = vmax.xlane.f32.xlu1 %v1239_v23 }
 0x106   :  { %428 = vmax.xlane.f32.xlu0 %v1252_v26 }
 0x107   :  { %430 = vmax.xlane.f32.xlu1 %v1247_v25 }
 0x10a   :  { %400 = vmax.xlane.f32.xlu0 %v1260_v28 }
 0x10b   :  { %402 = vmax.xlane.f32.xlu1 %v1255_v27 }
 0x10e   :  { %432 = vmax.xlane.f32.xlu0 %v1268_v30 }
 0x10f   :  { %434 = vmax.xlane.f32.xlu1 %v1263_v29 }
 0x112   :  { %404 = vmax.xlane.f32.xlu0 %v1276_v32 }
 0x113   :  { %406 = vmax.xlane.f32.xlu1 %v1271_v31 }
 0x116   :  { %436 = vmax.xlane.f32.xlu0 %v1284_v34 }
 0x117   :  { %438 = vmax.xlane.f32.xlu1 %v1279_v33 }
 0x11a   :  { %408 = vmax.xlane.f32.xlu0 %v1292_v36 }
 0x11b   :  { %410 = vmax.xlane.f32.xlu1 %v1287_v35 }
 0x11e   :  { %440 = vmax.xlane.f32.xlu0 %v1300_v39 }
 0x11f   :  { %442 = vmax.xlane.f32.xlu1 %v1295_v37 }
 0x16f   :  { %v383_v43 = vpop.xlane.xlu0 %382 }
 0x170   :  { %v415_v40 = vpop.xlane.xlu1 %414  ;;  %v445_v45 = vsub.f32 %v1177_v41, %v383_v43 }
 0x171   :  { %v461_v44 = vsub.f32 %v1180_v42, %v415_v40 }
 0x172   :  { %v478_v46 = vmul.f32 1.442695, %v445_v45 }
 0x173   :  { %v381_v50 = vpop.xlane.xlu0 %380  ;;  %v510_v52 = vmul.f32 1.442695, %v461_v44 }
 0x174   :  { %v387_v49 = vpop.xlane.xlu1 %386  ;;  %v444_v55 = vsub.f32 %v1185_v47, %v381_v50  ;;  %856 = vpow2.f32 %v478_v46 }
 0x175   :  { %v447_v53 = vsub.f32 %v1188_v48, %v387_v49  ;;  %858 = vpow2.f32 %v510_v52 }
 0x176   :  { %v476_v38 = vmul.f32 1.442695, %v444_v55 }
 0x177   :  { %v413_v57 = vpop.xlane.xlu0 %412  ;;  %v482_v58 = vmul.f32 1.442695, %v447_v53 }
 0x178   :  { %v419_v56 = vpop.xlane.xlu1 %418  ;;  %v460_v61 = vsub.f32 %v1196_v54, %v413_v57  ;;  %860 = vpow2.f32 %v476_v38 }
 0x179   :  { %v463_v42 = vsub.f32 %v1191_v51, %v419_v56  ;;  %862 = vpow2.f32 %v482_v58 }
 0x17a   :  { %v508_v41 = vmul.f32 1.442695, %v460_v61 }
 0x17b   :  { %v417_v1 = vpop.xlane.xlu0 %416  ;;  %v514_v48 = vmul.f32 1.442695, %v463_v42 }
 0x17c   :  { %v385_v62 = vpop.xlane.xlu1 %384  ;;  %864 = vpow2.f32 %v508_v41  ;;  %v462_v47 = vsub.f32 %v1204_v60, %v417_v1 }
 0x17d   :  { %v446_v2 = vsub.f32 %v1201_v59, %v385_v62 }
 0x17e   :  { %v1312_v4 = vpop.eup %856  ;;  %v512_v54 = vmul.f32 1.442695, %v462_v47 }
 0x17f   :  { %v480_v3 = vmul.f32 1.442695, %v446_v2  ;;  %v389_v8 = vpop.xlane.xlu0 %388  ;;  %542 = vadd.xlane.f32.xlu1 %v1312_v4  ;;  %v1317_v10 = vpop.eup %858 }
 0x180   :  { %v391_v7 = vpop.xlane.xlu1 %390  ;;  %v448_v9 = vsub.f32 %v1212_v0, %v389_v8 }
 0x181   :  { %866 = vpow2.f32 %v480_v3  ;;  %v449_v51 = vsub.f32 %v1207_v63, %v391_v7 }
 0x182   :  { %868 = vpow2.f32 %v514_v48  ;;  %v1319_v13 = vpop.eup %860  ;;  %v484_v63 = vmul.f32 1.442695, %v448_v9 }
 0x183   :  { %v486_v59 = vmul.f32 1.442695, %v449_v51  ;;  %v421_v14 = vpop.xlane.xlu0 %420  ;;  %574 = vadd.xlane.f32.xlu1 %v1317_v10  ;;  %540 = vadd.xlane.f32.xlu0 %v1319_v13  ;;  %v1325_v19 = vpop.eup %862 }
 0x184   :  { %v423_v60 = vpop.xlane.xlu1 %422  ;;  %v464_v16 = vsub.f32 %v1220_v6, %v421_v14 }
 0x185   :  { %870 = vpow2.f32 %v486_v59  ;;  %v465_v15 = vsub.f32 %v1215_v5, %v423_v60 }
 0x186   :  { %872 = vpow2.f32 %v512_v54  ;;  %v1327_v20 = vpop.eup %864  ;;  %v516_v5 = vmul.f32 1.442695, %v464_v16 }
 0x187   :  { %v518_v0 = vmul.f32 1.442695, %v465_v15  ;;  %v393_v22 = vpop.xlane.xlu0 %392  ;;  %546 = vadd.xlane.f32.xlu1 %v1325_v19  ;;  %572 = vadd.xlane.f32.xlu0 %v1327_v20 }
 0x188   :  { %v395_v21 = vpop.xlane.xlu1 %394  ;;  %v450_v43 = vsub.f32 %v1228_v12, %v393_v22 }
 0x189   :  { %874 = vpow2.f32 %v518_v0  ;;  %v451_v40 = vsub.f32 %v1223_v11, %v395_v21 }
 0x18a   :  { %876 = vpow2.f32 %v484_v63  ;;  %v488_v11 = vmul.f32 1.442695, %v450_v43 }
 0x18b   :  { %v1333_v44 = vpop.eup %866  ;;  %v490_v6 = vmul.f32 1.442695, %v451_v40  ;;  %v425_v49 = vpop.xlane.xlu0 %424 }
 0x18c   :  { %v1335_v45 = vpop.eup %868  ;;  %v427_v46 = vpop.xlane.xlu1 %426  ;;  %544 = vadd.xlane.f32.xlu0 %v1333_v44  ;;  %v466_v52 = vsub.f32 %v1236_v18, %v425_v49 }
 0x18d   :  { %878 = vpow2.f32 %v490_v6  ;;  %578 = vadd.xlane.f32.xlu1 %v1335_v45  ;;  %v467_v50 = vsub.f32 %v1231_v17, %v427_v46 }
 0x18e   :  { %880 = vpow2.f32 %v516_v5  ;;  %v520_v17 = vmul.f32 1.442695, %v466_v52 }
 0x18f   :  { %v1341_v53 = vpop.eup %870  ;;  %v522_v12 = vmul.f32 1.442695, %v467_v50  ;;  %v397_v56 = vpop.xlane.xlu0 %396 }
 0x190   :  { %v1343_v55 = vpop.eup %872  ;;  %v399_v38 = vpop.xlane.xlu1 %398  ;;  %v452_v58 = vsub.f32 %v1244_v24, %v397_v56 }
 0x191   :  { %882 = vpow2.f32 %v522_v12  ;;  %550 = vadd.xlane.f32.xlu1 %v1341_v53  ;;  %v453_v57 = vsub.f32 %v1239_v23, %v399_v38  ;;  %576 = vadd.xlane.f32.xlu0 %v1343_v55 }
 0x192   :  { %884 = vpow2.f32 %v488_v11  ;;  %v492_v23 = vmul.f32 1.442695, %v452_v58 }
 0x193   :  { %v1349_v61 = vpop.eup %874  ;;  %v494_v18 = vmul.f32 1.442695, %v453_v57  ;;  %v429_v62 = vpop.xlane.xlu0 %428 }
 0x194   :  { %v1351_v42 = vpop.eup %876  ;;  %v431_v41 = vpop.xlane.xlu1 %430  ;;  %v468_v2 = vsub.f32 %v1252_v26, %v429_v62 }
 0x195   :  { %886 = vpow2.f32 %v494_v18  ;;  %582 = vadd.xlane.f32.xlu1 %v1349_v61  ;;  %v469_v1 = vsub.f32 %v1247_v25, %v431_v41  ;;  %548 = vadd.xlane.f32.xlu0 %v1351_v42 }
 0x196   :  { %888 = vpow2.f32 %v520_v17  ;;  %v524_v25 = vmul.f32 1.442695, %v468_v2 }
 0x197   :  { %v1357_v48 = vpop.eup %878  ;;  %v526_v24 = vmul.f32 1.442695, %v469_v1  ;;  %v401_v7 = vpop.xlane.xlu0 %400 }
 0x198   :  { %v1359_v47 = vpop.eup %880  ;;  %v403_v3 = vpop.xlane.xlu1 %402  ;;  %v454_v51 = vsub.f32 %v1260_v28, %v401_v7 }
 0x199   :  { %890 = vpow2.f32 %v526_v24  ;;  %554 = vadd.xlane.f32.xlu1 %v1357_v48  ;;  %v455_v8 = vsub.f32 %v1255_v27, %v403_v3  ;;  %580 = vadd.xlane.f32.xlu0 %v1359_v47 }
 0x19a   :  { %892 = vpow2.f32 %v492_v23  ;;  %v496_v27 = vmul.f32 1.442695, %v454_v51 }
 0x19b   :  { %v1365_v54 = vpop.eup %882  ;;  %v498_v26 = vmul.f32 1.442695, %v455_v8  ;;  %v433_v60 = vpop.xlane.xlu0 %432 }
 0x19c   :  { %v1367_v9 = vpop.eup %884  ;;  %v435_v59 = vpop.xlane.xlu1 %434  ;;  %v470_v15 = vsub.f32 %v1268_v30, %v433_v60 }
 0x19d   :  { %894 = vpow2.f32 %v498_v26  ;;  %586 = vadd.xlane.f32.xlu1 %v1365_v54  ;;  %v471_v14 = vsub.f32 %v1263_v29, %v435_v59  ;;  %552 = vadd.xlane.f32.xlu0 %v1367_v9 }
 0x19e   :  { %896 = vpow2.f32 %v524_v25  ;;  %v528_v29 = vmul.f32 1.442695, %v470_v15 }
 0x19f   :  { %v1373_v63 = vpop.eup %886  ;;  %v530_v28 = vmul.f32 1.442695, %v471_v14  ;;  %v405_v21 = vpop.xlane.xlu0 %404 }
 0x1a0   :  { %v1375_v16 = vpop.eup %888  ;;  %v407_v0 = vpop.xlane.xlu1 %406  ;;  %v456_v40 = vsub.f32 %v1276_v32, %v405_v21 }
 0x1a1   :  { %898 = vpow2.f32 %v530_v28  ;;  %558 = vadd.xlane.f32.xlu1 %v1373_v63  ;;  %v457_v22 = vsub.f32 %v1271_v31, %v407_v0  ;;  %584 = vadd.xlane.f32.xlu0 %v1375_v16 }
 0x1a2   :  { %900 = vpow2.f32 %v496_v27  ;;  %v500_v31 = vmul.f32 1.442695, %v456_v40 }
 0x1a3   :  { %v1381_v5 = vpop.eup %890  ;;  %v502_v30 = vmul.f32 1.442695, %v457_v22  ;;  %v437_v46 = vpop.xlane.xlu0 %436 }
 0x1a4   :  { %v1383_v43 = vpop.eup %892  ;;  %v439_v6 = vpop.xlane.xlu1 %438  ;;  %v472_v50 = vsub.f32 %v1284_v34, %v437_v46 }
 0x1a5   :  { %902 = vpow2.f32 %v502_v30  ;;  %590 = vadd.xlane.f32.xlu1 %v1381_v5  ;;  %v473_v49 = vsub.f32 %v1279_v33, %v439_v6  ;;  %556 = vadd.xlane.f32.xlu0 %v1383_v43 }
 0x1a6   :  { %904 = vpow2.f32 %v528_v29  ;;  %v532_v33 = vmul.f32 1.442695, %v472_v50 }
 0x1a7   :  { %v1389_v11 = vpop.eup %894  ;;  %v534_v32 = vmul.f32 1.442695, %v473_v49  ;;  %v409_v38 = vpop.xlane.xlu0 %408 }
 0x1a8   :  { %v1391_v52 = vpop.eup %896  ;;  %v411_v12 = vpop.xlane.xlu1 %410  ;;  %v458_v57 = vsub.f32 %v1292_v36, %v409_v38 }
 0x1a9   :  { %906 = vpow2.f32 %v534_v32  ;;  %562 = vadd.xlane.f32.xlu1 %v1389_v11  ;;  %v459_v56 = vsub.f32 %v1287_v35, %v411_v12  ;;  %588 = vadd.xlane.f32.xlu0 %v1391_v52 }
 0x1aa   :  { %908 = vpow2.f32 %v500_v31  ;;  %v504_v35 = vmul.f32 1.442695, %v458_v57 }
 0x1ab   :  { %v1397_v17 = vpop.eup %898  ;;  %v506_v34 = vmul.f32 1.442695, %v459_v56  ;;  %v441_v41 = vpop.xlane.xlu0 %440 }
 0x1ac   :  { %v1399_v58 = vpop.eup %900  ;;  %v443_v18 = vpop.xlane.xlu1 %442  ;;  %v474_v1 = vsub.f32 %v1300_v39, %v441_v41 }
 0x1ad   :  { %910 = vpow2.f32 %v506_v34  ;;  %594 = vadd.xlane.f32.xlu1 %v1397_v17  ;;  %v475_v62 = vsub.f32 %v1295_v37, %v443_v18  ;;  %560 = vadd.xlane.f32.xlu0 %v1399_v58 }
 0x1ae   :  { %912 = vpow2.f32 %v532_v33  ;;  %v536_v24 = vmul.f32 1.442695, %v474_v1 }
 0x1af   :  { %v1405_v23 = vpop.eup %902  ;;  %v538_v36 = vmul.f32 1.442695, %v475_v62 }
 0x1b0   :  { %v1407_v2 = vpop.eup %904 }
 0x1b1   :  { %914 = vpow2.f32 %v538_v36  ;;  %566 = vadd.xlane.f32.xlu1 %v1405_v23  ;;  %592 = vadd.xlane.f32.xlu0 %v1407_v2 }
 0x1b2   :  { %916 = vpow2.f32 %v504_v35 }
 0x1b3   :  { %v1411_v3 = vpop.eup %906  ;;  %918 = vpow2.f32 %v536_v24 }
 0x1b4   :  { %v1413_v37 = vpop.eup %908 }
 0x1b5   :  { %598 = vadd.xlane.f32.xlu1 %v1411_v3  ;;  %564 = vadd.xlane.f32.xlu0 %v1413_v37 }
 0x1b7   :  { %v1417_v39 = vpop.eup %910 }
 0x1b8   :  { %v1419_v7 = vpop.eup %912 }
 0x1b9   :  { %570 = vadd.xlane.f32.xlu1 %v1417_v39  ;;  %596 = vadd.xlane.f32.xlu0 %v1419_v7 }
 0x1bb   :  { %v1423_v8 = vpop.eup %914 }
 0x1bc   :  { %v1425_v25 = vpop.eup %916 }
 0x1bd   :  { %602 = vadd.xlane.f32.xlu1 %v1423_v8  ;;  %568 = vadd.xlane.f32.xlu0 %v1425_v25  ;;  %v1429_v51 = vpop.eup %918 }
 0x1c1   :  { %600 = vadd.xlane.f32.xlu0 %v1429_v51 }
 0x20c   :  { %v543_v26 = vpop.xlane.xlu1 %542 }
 0x20d   :  { %920 = vrcp.f32 %v543_v26 }
 0x210   :  { %v575_v59 = vpop.xlane.xlu1 %574  ;;  %v541_v60 = vpop.xlane.xlu0 %540 }
 0x211   :  { %922 = vrcp.f32 %v575_v59 }
 0x212   :  { %924 = vrcp.f32 %v541_v60 }
 0x214   :  { %v547_v14 = vpop.xlane.xlu1 %546  ;;  %v573_v27 = vpop.xlane.xlu0 %572 }
 0x215   :  { %926 = vrcp.f32 %v547_v14 }
 0x216   :  { %928 = vrcp.f32 %v573_v27 }
 0x217   :  { %v921_v15 = vpop.eup %920 }
 0x218   :  { %v607_v28 = vmul.f32 %v921_v15, %v1312_v4 }
 0x219   :  { %v545_v21 = vpop.xlane.xlu0 %544 }
 0x21a   :  { %v579_v0 = vpop.xlane.xlu1 %578  ;;  %669 = vst [vmem:[#allocation2 + $0x8] sm:$0xff] %v607_v28 }
 0x21b   :  { %930 = vrcp.f32 %v579_v0  ;;  %v923_v22 = vpop.eup %922 }
 0x21c   :  { %932 = vrcp.f32 %v545_v21  ;;  %v925_v29 = vpop.eup %924  ;;  %v639_v40 = vmul.f32 %v923_v22, %v1317_v10 }
 0x21d   :  { %v605_v46 = vmul.f32 %v925_v29, %v1319_v13 }
 0x21e   :  { %v551_v30 = vpop.xlane.xlu1 %550  ;;  %v577_v6 = vpop.xlane.xlu0 %576  ;;  %685 = vst [vmem:[#allocation2 + $0x88] sm:$0xff] %v639_v40 }
 0x21f   :  { %934 = vrcp.f32 %v551_v30  ;;  %v927_v49 = vpop.eup %926  ;;  %668 = vst [vmem:[#allocation2] sm:$0xff] %v605_v46 }
 0x220   :  { %936 = vrcp.f32 %v577_v6  ;;  %v929_v31 = vpop.eup %928  ;;  %v611_v4 = vmul.f32 %v927_v49, %v1325_v19 }
 0x221   :  { %v637_v12 = vmul.f32 %v929_v31, %v1327_v20 }
 0x222   :  { %v583_v50 = vpop.xlane.xlu1 %582  ;;  %v549_v32 = vpop.xlane.xlu0 %548  ;;  %671 = vst [vmem:[#allocation2 + $0x18] sm:$0xff] %v611_v4 }
 0x223   :  { %938 = vrcp.f32 %v583_v50  ;;  %684 = vst [vmem:[#allocation2 + $0x80] sm:$0xff] %v637_v12 }
 0x224   :  { %940 = vrcp.f32 %v549_v32 }
 0x225   :  { %v931_v10 = vpop.eup %930 }
 0x226   :  { %v933_v38 = vpop.eup %932  ;;  %v643_v13 = vmul.f32 %v931_v10, %v1335_v45  ;;  %v555_v56 = vpop.xlane.xlu1 %554 }
 0x227   :  { %v581_v33 = vpop.xlane.xlu0 %580  ;;  %v609_v57 = vmul.f32 %v933_v38, %v1333_v44  ;;  %942 = vrcp.f32 %v555_v56 }
 0x228   :  { %687 = vst [vmem:[#allocation2 + $0x98] sm:$0xff] %v643_v13  ;;  %944 = vrcp.f32 %v581_v33 }
 0x229   :  { %v935_v19 = vpop.eup %934  ;;  %670 = vst [vmem:[#allocation2 + $0x10] sm:$0xff] %v609_v57 }
 0x22a   :  { %v937_v34 = vpop.eup %936  ;;  %v615_v20 = vmul.f32 %v935_v19, %v1341_v53  ;;  %v587_v18 = vpop.xlane.xlu1 %586 }
 0x22b   :  { %v553_v41 = vpop.xlane.xlu0 %552  ;;  %v641_v62 = vmul.f32 %v937_v34, %v1343_v55  ;;  %946 = vrcp.f32 %v587_v18 }
 0x22c   :  { %673 = vst [vmem:[#allocation2 + $0x28] sm:$0xff] %v615_v20  ;;  %948 = vrcp.f32 %v553_v41 }
 0x22d   :  { %v939_v45 = vpop.eup %938  ;;  %686 = vst [vmem:[#allocation2 + $0x90] sm:$0xff] %v641_v62 }
 0x22e   :  { %v941_v35 = vpop.eup %940  ;;  %v647_v44 = vmul.f32 %v939_v45, %v1349_v61  ;;  %v559_v1 = vpop.xlane.xlu1 %558 }
 0x22f   :  { %v585_v36 = vpop.xlane.xlu0 %584  ;;  %v613_v24 = vmul.f32 %v941_v35, %v1351_v42  ;;  %950 = vrcp.f32 %v559_v1 }
 0x230   :  { %689 = vst [vmem:[#allocation2 + $0xa8] sm:$0xff] %v647_v44  ;;  %952 = vrcp.f32 %v585_v36 }
 0x231   :  { %v943_v53 = vpop.eup %942  ;;  %672 = vst [vmem:[#allocation2 + $0x20] sm:$0xff] %v613_v24 }
 0x232   :  { %v945_v26 = vpop.eup %944  ;;  %v619_v55 = vmul.f32 %v943_v53, %v1357_v48  ;;  %v591_v59 = vpop.xlane.xlu1 %590 }
 0x233   :  { %v557_v60 = vpop.xlane.xlu0 %556  ;;  %v645_v14 = vmul.f32 %v945_v26, %v1359_v47  ;;  %954 = vrcp.f32 %v591_v59 }
 0x234   :  { %675 = vst [vmem:[#allocation2 + $0x38] sm:$0xff] %v619_v55  ;;  %956 = vrcp.f32 %v557_v60 }
 0x235   :  { %v947_v61 = vpop.eup %946  ;;  %688 = vst [vmem:[#allocation2 + $0xa0] sm:$0xff] %v645_v14 }
 0x236   :  { %v949_v27 = vpop.eup %948  ;;  %v651_v42 = vmul.f32 %v947_v61, %v1365_v54  ;;  %v563_v15 = vpop.xlane.xlu1 %562 }
 0x237   :  { %v589_v28 = vpop.xlane.xlu0 %588  ;;  %v617_v0 = vmul.f32 %v949_v27, %v1367_v9  ;;  %958 = vrcp.f32 %v563_v15 }
 0x238   :  { %691 = vst [vmem:[#allocation2 + $0xb8] sm:$0xff] %v651_v42  ;;  %960 = vrcp.f32 %v589_v28 }
 0x239   :  { %v951_v48 = vpop.eup %950  ;;  %674 = vst [vmem:[#allocation2 + $0x30] sm:$0xff] %v617_v0 }
 0x23a   :  { %v953_v21 = vpop.eup %952  ;;  %v623_v47 = vmul.f32 %v951_v48, %v1373_v63  ;;  %v595_v22 = vpop.xlane.xlu1 %594 }
 0x23b   :  { %v561_v29 = vpop.xlane.xlu0 %560  ;;  %v649_v40 = vmul.f32 %v953_v21, %v1375_v16  ;;  %962 = vrcp.f32 %v595_v22 }
 0x23c   :  { %677 = vst [vmem:[#allocation2 + $0x48] sm:$0xff] %v623_v47  ;;  %964 = vrcp.f32 %v561_v29 }
 0x23d   :  { %v955_v54 = vpop.eup %954  ;;  %690 = vst [vmem:[#allocation2 + $0xb0] sm:$0xff] %v649_v40 }
 0x23e   :  { %v957_v30 = vpop.eup %956  ;;  %v655_v9 = vmul.f32 %v955_v54, %v1381_v5  ;;  %v567_v6 = vpop.xlane.xlu1 %566 }
 0x23f   :  { %v593_v46 = vpop.xlane.xlu0 %592  ;;  %v621_v49 = vmul.f32 %v957_v30, %v1383_v43  ;;  %966 = vrcp.f32 %v567_v6 }
 0x240   :  { %693 = vst [vmem:[#allocation2 + $0xc8] sm:$0xff] %v655_v9  ;;  %968 = vrcp.f32 %v593_v46 }
 0x241   :  { %v959_v63 = vpop.eup %958  ;;  %676 = vst [vmem:[#allocation2 + $0x40] sm:$0xff] %v621_v49 }
 0x242   :  { %v961_v31 = vpop.eup %960  ;;  %v627_v16 = vmul.f32 %v959_v63, %v1389_v11  ;;  %v599_v4 = vpop.xlane.xlu1 %598 }
 0x243   :  { %v565_v50 = vpop.xlane.xlu0 %564  ;;  %v653_v32 = vmul.f32 %v961_v31, %v1391_v52  ;;  %970 = vrcp.f32 %v599_v4 }
 0x244   :  { %679 = vst [vmem:[#allocation2 + $0x58] sm:$0xff] %v627_v16  ;;  %972 = vrcp.f32 %v565_v50 }
 0x245   :  { %v963_v5 = vpop.eup %962  ;;  %692 = vst [vmem:[#allocation2 + $0xc0] sm:$0xff] %v653_v32 }
 0x246   :  { %v965_v12 = vpop.eup %964  ;;  %v659_v43 = vmul.f32 %v963_v5, %v1397_v17  ;;  %v571_v10 = vpop.xlane.xlu1 %570 }
 0x247   :  { %v597_v38 = vpop.xlane.xlu0 %596  ;;  %v625_v13 = vmul.f32 %v965_v12, %v1399_v58  ;;  %974 = vrcp.f32 %v571_v10 }
 0x248   :  { %695 = vst [vmem:[#allocation2 + $0xd8] sm:$0xff] %v659_v43  ;;  %976 = vrcp.f32 %v597_v38 }
 0x249   :  { %v967_v11 = vpop.eup %966  ;;  %678 = vst [vmem:[#allocation2 + $0x50] sm:$0xff] %v625_v13 }
 0x24a   :  { %v969_v56 = vpop.eup %968  ;;  %v631_v52 = vmul.f32 %v967_v11, %v1405_v23  ;;  %v603_v33 = vpop.xlane.xlu1 %602 }
 0x24b   :  { %v569_v57 = vpop.xlane.xlu0 %568  ;;  %v657_v19 = vmul.f32 %v969_v56, %v1407_v2  ;;  %978 = vrcp.f32 %v603_v33 }
 0x24c   :  { %681 = vst [vmem:[#allocation2 + $0x68] sm:$0xff] %v631_v52  ;;  %980 = vrcp.f32 %v569_v57 }
 0x24d   :  { %v971_v17 = vpop.eup %970  ;;  %694 = vst [vmem:[#allocation2 + $0xd0] sm:$0xff] %v657_v19 }
 0x24e   :  { %v973_v34 = vpop.eup %972  ;;  %v663_v58 = vmul.f32 %v971_v17, %v1411_v3 }
 0x24f   :  { %v601_v20 = vpop.xlane.xlu0 %600  ;;  %v629_v18 = vmul.f32 %v973_v34, %v1413_v37 }
 0x250   :  { %982 = vrcp.f32 %v601_v20  ;;  %697 = vst [vmem:[#allocation2 + $0xe8] sm:$0xff] %v663_v58 }
 0x251   :  { %v975_v41 = vpop.eup %974  ;;  %680 = vst [vmem:[#allocation2 + $0x60] sm:$0xff] %v629_v18 }
 0x252   :  { %v977_v23 = vpop.eup %976  ;;  %v635_v62 = vmul.f32 %v975_v41, %v1417_v39 }
 0x253   :  { %v661_v2 = vmul.f32 %v977_v23, %v1419_v7 }
 0x254   :  { %683 = vst [vmem:[#allocation2 + $0x78] sm:$0xff] %v635_v62 }
 0x255   :  { %v979_v45 = vpop.eup %978  ;;  %696 = vst [vmem:[#allocation2 + $0xe0] sm:$0xff] %v661_v2 }
 0x256   :  { %v981_v35 = vpop.eup %980  ;;  %v667_v44 = vmul.f32 %v979_v45, %v1423_v8 }
 0x257   :  { %v633_v3 = vmul.f32 %v981_v35, %v1425_v25 }
 0x258   :  { %699 = vst [vmem:[#allocation2 + $0xf8] sm:$0xff] %v667_v44 }
 0x259   :  { %682 = vst [vmem:[#allocation2 + $0x70] sm:$0xff] %v633_v3 }
 0x25a   :  { %v983_v37 = vpop.eup %982 }
 0x25b   :  { %v665_v1 = vmul.f32 %v983_v37, %v1429_v51 }
 0x25d   :  { %698 = vst [vmem:[#allocation2 + $0xf0] sm:$0xff] %v665_v1 }
 0x25e   :  { %995 = shalt.err (!%p992_p4)
}
 0x25f   :  { %s996_s5 = scalar_lea.hbm %s1479_s3, 4096 }
 0x260   :  { %p997_p5 = scmp.ne.s32.totalorder %s1479_s3, %s996_s5  ;;  %p1000_p6 = scmp.lt.u32.totalorder %s996_s5, %s1479_s3 }
 0x262   :  { %p1002_p7 = pnand %p1000_p6, %p997_p5 }
 0x264   :  { %1005 = shalt.err (!%p1002_p7)
}
 0x265   :  { %s1009_s10 = smov 128   ;;  %s1010_s11 = smov 8  }
 0x266   :  { %711 = dma.vmem_to_hbm [thread:$0]  %s706_s2, 4096, %s1479_s3, [#allocation3], %s1009_s10, %s1009_s10, %s1010_s11  }
 0x267   :  { %1006 = dma.done.wait [#allocation3], 4096  }
 0x268   :  { %1007 = vsyncadd [#allocation3], 4294963200 }
 0x269   :  { %715 = vsyncpa [#allocation3], 1 }

</bundles_post_ra>
